<compile_context>
chip_gen: v7x
topology: tpu7x:2x2x1
jax: 0.10.0
libtpu: 0.0.40
codegen_flags: <defaults>
</compile_context>

<pallas_src>
import numpy as np

import jax
import jax.numpy as jnp
from jax.experimental import pallas as pl
from jax.experimental.pallas import tpu as pltpu


# ----------------------- fused-im2col 3x3 conv kernel ------------------------
def conv3x3_banded_kernel(x_ref, w_ref, b_ref, o_ref):
    # x_ref: (N, Hp, Wp*Cin)       padded input, (w, cin) fused on lanes (K = 256)
    # w_ref: (KH, Wp*Cin, W*Cout)  per-kh banded weights (im2col folded into weight)
    # b_ref: (1, W*Cout)           bias tiled over w
    # o_ref: (N, H, W*Cout)        lane-dense output, (w, cout) fused on lanes
    n_batch = x_ref.shape[0]
    kh_taps = w_ref.shape[0]
    h_out = o_ref.shape[1]
    for n in range(n_batch):                      # static unroll, N = 2
        # Each kh tap is just a shifted sublane-slice of the VMEM-resident input;
        # no in-kernel reshape/concat, only 2-D MXU dots accumulating in f32.
        acc = jnp.dot(x_ref[n, pl.ds(0, h_out), :], w_ref[0],
                      preferred_element_type=jnp.float32)
        for kh in range(1, kh_taps):
            acc = acc + jnp.dot(x_ref[n, pl.ds(kh, h_out), :], w_ref[kh],
                                preferred_element_type=jnp.float32)
        o_ref[n] = (acc + b_ref[...]).astype(o_ref.dtype)


def conv2d_3x3_pad1(x_nchw, w_banded, b_row):
    """Conv2d(Cin->Cout, 3x3, padding=1) as one fused-im2col Pallas call.

    Returns the output in NHWC (N, H, W, Cout).  The NCHW transpose is
    intentionally skipped (lane-dense layout kept for any downstream consumer).
    """
    n, cin, h, w = x_nchw.shape
    kh_, wpcin, wcout = w_banded.shape
    assert kh_ == 3
    cout = wcout // w
    assert wpcin % cin == 0
    wp = wpcin // cin
    hp = h + kh_ - 1
    assert wp >= w + 2

    # One small XLA fusion: NCHW -> NHWC, zero-pad H by 1 each side and W up to
    # Wp (left 1, right Wp-W-1, so Wp*Cin is lane-aligned), fuse (W, Cin) lanes.
    x_nhwc = jnp.transpose(x_nchw, (0, 2, 3, 1))
    xpad = jnp.pad(x_nhwc, ((0, 0), (1, 1), (1, wp - w - 1), (0, 0)))
    x_fused = xpad.reshape(n, hp, wp * cin)                 # (2, 12, 256) ~ 24 KiB

    out = pl.pallas_call(
        conv3x3_banded_kernel,
        out_shape=jax.ShapeDtypeStruct((n, h, w * cout), jnp.float32),
        # Whole-array VMEM blocks, no grid -> single invocation, no pipeline bufs.
        in_specs=[pl.BlockSpec(memory_space=pltpu.MemorySpace.VMEM)] * 3,
        out_specs=pl.BlockSpec(memory_space=pltpu.MemorySpace.VMEM),
    )(x_fused, w_banded, b_row)

    return out.reshape(n, h, w, cout)                       # NHWC view (bitcast)


# ----------------------------- weight packing --------------------------------
def pack_conv_weights_banded(conv_w, conv_b, w_out):
    """Fold im2col into the weights: per-kh banded matrices.

    w_banded[kh, wp*Cin + c, w*Cout + co] = conv_w[co, c, kh, wp - w]
        for wp - w in {0, 1, 2}, else 0,   with Wp*Cin rounded up to 128 lanes.
    b_row[0, w*Cout + co] = conv_b[co].
    """
    cout, cin, kh_, kw_ = conv_w.shape
    wp_min = w_out + kw_ - 1                         # 12 padded columns used
    k_lanes = -(-(wp_min * cin) // 128) * 128        # -> 256 (lane-aligned K)
    assert k_lanes % cin == 0
    wp = k_lanes // cin                              # -> 16
    w_np = np.asarray(conv_w, dtype=np.float32)
    wb = np.zeros((kh_, wp * cin, w_out * cout), np.float32)
    for kh in range(kh_):
        for kw in range(kw_):
            tap = w_np[:, :, kh, kw].T               # (Cin, Cout)
            for w in range(w_out):
                p = w + kw
                wb[kh, p * cin:(p + 1) * cin, w * cout:(w + 1) * cout] = tap
    b_row = np.tile(np.asarray(conv_b, dtype=np.float32), w_out)[None, :]
    return jnp.asarray(wb), jnp.asarray(b_row)


# ---------------------------------- Model ------------------------------------
def init_params():
    # TODO(synk): torch.manual_seed(7) init cannot be reproduced bit-exactly in
    # JAX; the same Kaiming-uniform bound is used with a JAX PRNG.
    key = jax.random.PRNGKey(7)
    k_w, k_b = jax.random.split(key)
    cin, cout, kh, kw = 16, 32, 3, 3
    bound = 1.0 / np.sqrt(cin * kh * kw)
    conv_w = jax.random.uniform(k_w, (cout, cin, kh, kw), jnp.float32, -bound, bound)
    conv_b = jax.random.uniform(k_b, (cout,), jnp.float32, -bound, bound)
    # All layout work hoisted to init: banded per-kh weights + tiled bias row.
    w_banded, b_row = pack_conv_weights_banded(conv_w, conv_b, w_out=10)
    bn_gamma = jnp.ones((3,), jnp.float32)    # kept for module fidelity, unused
    bn_beta = jnp.zeros((3,), jnp.float32)
    params = (w_banded, b_row, bn_gamma, bn_beta)
    return params, (conv_w, conv_b)


def model_forward(x3, params):
    w_banded, b_row, bn_gamma, bn_beta = params
    y1 = conv2d_3x3_pad1(x3, w_banded, b_row)            # (2, 10, 10, 32) NHWC
    # TODO(synk): in the reference, self.bn (BatchNorm2d(3)) and the second
    # self.conv (expects 16 in-channels) are applied to the 32-channel y1 and
    # raise in PyTorch; those invalid steps are intentionally not executed.
    del bn_gamma, bn_beta
    return None, y1  # forward() returns None; y1 only for the readiness check


if __name__ == "__main__":
    params, (conv_w, conv_b) = init_params()
    x3 = jax.random.normal(jax.random.PRNGKey(0), (2, 16, 10, 10), jnp.float32)

    fwd = jax.jit(model_forward)
    result, y1 = fwd(x3, params)
    jax.block_until_ready(y1)

    # Correctness check of the Pallas conv against a float32 numpy reference.
    x_np = np.asarray(x3)
    w_np = np.asarray(conv_w)
    b_np = np.asarray(conv_b)
    xp_np = np.pad(x_np, ((0, 0), (0, 0), (1, 1), (1, 1)))
    ref = np.zeros((2, 32, 10, 10), np.float32)
    for kh in range(3):
        for kw in range(3):
            ref += np.einsum('oc,nchw->nohw', w_np[:, :, kh, kw],
                             xp_np[:, :, kh:kh + 10, kw:kw + 10])
    ref += b_np[None, :, None, None]
    got = np.transpose(np.asarray(y1), (0, 3, 1, 2))   # NHWC -> NCHW, test only
    np.testing.assert_allclose(got, ref, rtol=5e-3, atol=5e-3)

    assert result is None
    print("KERNEL_OK")
</pallas_src>

<mosaic_0001>
module attributes {stable_mosaic.version = 11 : i64} {
  func.func @conv3x3_banded_kernel(%arg0: memref<2x12x256xf32, #tpu.memory_space<vmem>>, %arg1: memref<3x256x320xf32, #tpu.memory_space<vmem>>, %arg2: memref<1x320xf32, #tpu.memory_space<vmem>>, %arg3: memref<2x10x320xf32, #tpu.memory_space<vmem>>) attributes {dimension_semantics = [], scalar_prefetch = 0 : i64, scratch_operands = 0 : i64, tpu.core_type = #tpu.core_type<tc>} {
    %c0 = arith.constant 0 : index
    %c0_0 = arith.constant 0 : index
    %c0_1 = arith.constant 0 : index
    %0 = vector.load %arg0[%c0, %c0_0, %c0_1] : memref<2x12x256xf32, #tpu.memory_space<vmem>>, vector<1x10x256xf32>
    %1 = vector.shape_cast %0 : vector<1x10x256xf32> to vector<10x256xf32>
    %c0_2 = arith.constant 0 : index
    %c0_3 = arith.constant 0 : index
    %c0_4 = arith.constant 0 : index
    %2 = vector.load %arg1[%c0_2, %c0_3, %c0_4] : memref<3x256x320xf32, #tpu.memory_space<vmem>>, vector<1x256x320xf32>
    %3 = vector.shape_cast %2 : vector<1x256x320xf32> to vector<256x320xf32>
    %cst = arith.constant dense<0.000000e+00> : vector<10x320xf32>
    %4 = tpu.matmul %1, %3, %cst {dimension_numbers = #tpu.dot_dimension_numbers<[1], [0], [0], [1], [0, 0, 1, 1], [], []>} : vector<10x256xf32>, vector<256x320xf32>, vector<10x320xf32> -> vector<10x320xf32>
    %c0_5 = arith.constant 0 : index
    %c1 = arith.constant 1 : index
    %c0_6 = arith.constant 0 : index
    %5 = vector.load %arg0[%c0_5, %c1, %c0_6] : memref<2x12x256xf32, #tpu.memory_space<vmem>>, vector<1x10x256xf32>
    %6 = vector.shape_cast %5 : vector<1x10x256xf32> to vector<10x256xf32>
    %c1_7 = arith.constant 1 : index
    %c0_8 = arith.constant 0 : index
    %c0_9 = arith.constant 0 : index
    %7 = vector.load %arg1[%c1_7, %c0_8, %c0_9] : memref<3x256x320xf32, #tpu.memory_space<vmem>>, vector<1x256x320xf32>
    %8 = vector.shape_cast %7 : vector<1x256x320xf32> to vector<256x320xf32>
    %cst_10 = arith.constant dense<0.000000e+00> : vector<10x320xf32>
    %9 = tpu.matmul %6, %8, %cst_10 {dimension_numbers = #tpu.dot_dimension_numbers<[1], [0], [0], [1], [0, 0, 1, 1], [], []>} : vector<10x256xf32>, vector<256x320xf32>, vector<10x320xf32> -> vector<10x320xf32>
    %10 = arith.addf %4, %9 : vector<10x320xf32>
    %c0_11 = arith.constant 0 : index
    %c2 = arith.constant 2 : index
    %c0_12 = arith.constant 0 : index
    %11 = vector.load %arg0[%c0_11, %c2, %c0_12] : memref<2x12x256xf32, #tpu.memory_space<vmem>>, vector<1x10x256xf32>
    %12 = vector.shape_cast %11 : vector<1x10x256xf32> to vector<10x256xf32>
    %c2_13 = arith.constant 2 : index
    %c0_14 = arith.constant 0 : index
    %c0_15 = arith.constant 0 : index
    %13 = vector.load %arg1[%c2_13, %c0_14, %c0_15] : memref<3x256x320xf32, #tpu.memory_space<vmem>>, vector<1x256x320xf32>
    %14 = vector.shape_cast %13 : vector<1x256x320xf32> to vector<256x320xf32>
    %cst_16 = arith.constant dense<0.000000e+00> : vector<10x320xf32>
    %15 = tpu.matmul %12, %14, %cst_16 {dimension_numbers = #tpu.dot_dimension_numbers<[1], [0], [0], [1], [0, 0, 1, 1], [], []>} : vector<10x256xf32>, vector<256x320xf32>, vector<10x320xf32> -> vector<10x320xf32>
    %16 = arith.addf %10, %15 : vector<10x320xf32>
    %c0_17 = arith.constant 0 : index
    %c0_18 = arith.constant 0 : index
    %17 = vector.load %arg2[%c0_17, %c0_18] : memref<1x320xf32, #tpu.memory_space<vmem>>, vector<1x320xf32>
    %18 = vector.broadcast %17 : vector<1x320xf32> to vector<10x320xf32>
    %19 = arith.addf %16, %18 : vector<10x320xf32>
    %c0_19 = arith.constant 0 : index
    %c0_20 = arith.constant 0 : index
    %c0_21 = arith.constant 0 : index
    %20 = vector.load %arg3[%c0_19, %c0_20, %c0_21] : memref<2x10x320xf32, #tpu.memory_space<vmem>>, vector<1x10x320xf32>
    %21 = vector.shape_cast %20 : vector<1x10x320xf32> to vector<10x320xf32>
    %22 = vector.shape_cast %19 : vector<10x320xf32> to vector<1x10x320xf32>
    tpu.vector_store %arg3[%c0_19, %c0_20, %c0_21], %22 {strides = array<i32>} : memref<2x10x320xf32, #tpu.memory_space<vmem>>, vector<1x10x320xf32>,
    %c1_22 = arith.constant 1 : index
    %c0_23 = arith.constant 0 : index
    %c0_24 = arith.constant 0 : index
    %23 = vector.load %arg0[%c1_22, %c0_23, %c0_24] : memref<2x12x256xf32, #tpu.memory_space<vmem>>, vector<1x10x256xf32>
    %24 = vector.shape_cast %23 : vector<1x10x256xf32> to vector<10x256xf32>
    %c0_25 = arith.constant 0 : index
    %c0_26 = arith.constant 0 : index
    %c0_27 = arith.constant 0 : index
    %25 = vector.load %arg1[%c0_25, %c0_26, %c0_27] : memref<3x256x320xf32, #tpu.memory_space<vmem>>, vector<1x256x320xf32>
    %26 = vector.shape_cast %25 : vector<1x256x320xf32> to vector<256x320xf32>
    %cst_28 = arith.constant dense<0.000000e+00> : vector<10x320xf32>
    %27 = tpu.matmul %24, %26, %cst_28 {dimension_numbers = #tpu.dot_dimension_numbers<[1], [0], [0], [1], [0, 0, 1, 1], [], []>} : vector<10x256xf32>, vector<256x320xf32>, vector<10x320xf32> -> vector<10x320xf32>
    %c1_29 = arith.constant 1 : index
    %c1_30 = arith.constant 1 : index
    %c0_31 = arith.constant 0 : index
    %28 = vector.load %arg0[%c1_29, %c1_30, %c0_31] : memref<2x12x256xf32, #tpu.memory_space<vmem>>, vector<1x10x256xf32>
    %29 = vector.shape_cast %28 : vector<1x10x256xf32> to vector<10x256xf32>
    %c1_32 = arith.constant 1 : index
    %c0_33 = arith.constant 0 : index
    %c0_34 = arith.constant 0 : index
    %30 = vector.load %arg1[%c1_32, %c0_33, %c0_34] : memref<3x256x320xf32, #tpu.memory_space<vmem>>, vector<1x256x320xf32>
    %31 = vector.shape_cast %30 : vector<1x256x320xf32> to vector<256x320xf32>
    %cst_35 = arith.constant dense<0.000000e+00> : vector<10x320xf32>
    %32 = tpu.matmul %29, %31, %cst_35 {dimension_numbers = #tpu.dot_dimension_numbers<[1], [0], [0], [1], [0, 0, 1, 1], [], []>} : vector<10x256xf32>, vector<256x320xf32>, vector<10x320xf32> -> vector<10x320xf32>
    %33 = arith.addf %27, %32 : vector<10x320xf32>
    %c1_36 = arith.constant 1 : index
    %c2_37 = arith.constant 2 : index
    %c0_38 = arith.constant 0 : index
    %34 = vector.load %arg0[%c1_36, %c2_37, %c0_38] : memref<2x12x256xf32, #tpu.memory_space<vmem>>, vector<1x10x256xf32>
    %35 = vector.shape_cast %34 : vector<1x10x256xf32> to vector<10x256xf32>
    %c2_39 = arith.constant 2 : index
    %c0_40 = arith.constant 0 : index
    %c0_41 = arith.constant 0 : index
    %36 = vector.load %arg1[%c2_39, %c0_40, %c0_41] : memref<3x256x320xf32, #tpu.memory_space<vmem>>, vector<1x256x320xf32>
    %37 = vector.shape_cast %36 : vector<1x256x320xf32> to vector<256x320xf32>
    %cst_42 = arith.constant dense<0.000000e+00> : vector<10x320xf32>
    %38 = tpu.matmul %35, %37, %cst_42 {dimension_numbers = #tpu.dot_dimension_numbers<[1], [0], [0], [1], [0, 0, 1, 1], [], []>} : vector<10x256xf32>, vector<256x320xf32>, vector<10x320xf32> -> vector<10x320xf32>
    %39 = arith.addf %33, %38 : vector<10x320xf32>
    %c0_43 = arith.constant 0 : index
    %c0_44 = arith.constant 0 : index
    %40 = vector.load %arg2[%c0_43, %c0_44] : memref<1x320xf32, #tpu.memory_space<vmem>>, vector<1x320xf32>
    %41 = vector.broadcast %40 : vector<1x320xf32> to vector<10x320xf32>
    %42 = arith.addf %39, %41 : vector<10x320xf32>
    %c1_45 = arith.constant 1 : index
    %c0_46 = arith.constant 0 : index
    %c0_47 = arith.constant 0 : index
    %43 = vector.load %arg3[%c1_45, %c0_46, %c0_47] : memref<2x10x320xf32, #tpu.memory_space<vmem>>, vector<1x10x320xf32>
    %44 = vector.shape_cast %43 : vector<1x10x320xf32> to vector<10x320xf32>
    %45 = vector.shape_cast %42 : vector<10x320xf32> to vector<1x10x320xf32>
    tpu.vector_store %arg3[%c1_45, %c0_46, %c0_47], %45 {strides = array<i32>} : memref<2x10x320xf32, #tpu.memory_space<vmem>>, vector<1x10x320xf32>,
    return
  }
}

</mosaic_0001>

<bundles_post_ra>
// kernel: model_forward.1
= control target key start
LH: loop header
LB: loop body
LE: loop exit
PB: predicated region body
PF: predicated region fallthrough
CT: control target
= control target key end

     0   :  { %vm219_vm0 = vcmask 1046528   ;;  %vm639_vm1 = vcmask 1045504   ;;  %vm833_vm2 = vcmask 523264   ;;  %vm837_vm3 = vcmask 517120   ;;  %s4637_s1 = inlined_call_operand.vmem [shape: f32[3,256,320], index: 1, kind: input, shape index: {}]   ;;  %s4638_s0 = inlined_call_operand.vmem [shape: f32[2,12,256], index: 0, kind: input, shape index: {}]   ;;  %s4639_s2 = inlined_call_operand.vmem [shape: f32[1,320], index: 2, kind: input, shape index: {}]   ;;  %s4640_s3 = inlined_call_operand.vmem [shape: f32[2,10,320], index: 3, kind: output, shape index: {}]  }
   0x1   :  { %v1665_v0 = vld [vmem:[%s4637_s1 + $0x308] sm:$0xff]  ;;  %v1668_v1 = vld [vmem:[%s4637_s1 + $0x320] sm:$0xff]  ;;  %v68_v2 = vld [vmem:[%s4637_s1 + $0x190] sm:$0xff] }
   0x2   :  { %v2915_v3 = vpack.c.bf16 %v1668_v1, %v1665_v0  ;;  %v71_v4 = vld [vmem:[%s4637_s1 + $0x1a8] sm:$0xff]  ;;  %v1664_v5 = vld [vmem:[%s4637_s1 + $0x300] sm:$0xff]  ;;  %v1667_v6 = vld [vmem:[%s4637_s1 + $0x318] sm:$0xff] }
   0x3   :  { %v2454_v7 = vpack.c.bf16 %v71_v4, %v68_v2  ;;  %v2926_v8 = vpack.c.bf16 %v1667_v6, %v1664_v5  ;;  %v20_v9 = vld [vmem:[%s4637_s1 + $0x10] sm:$0xff]  ;;  %v23_v10 = vld [vmem:[%s4637_s1 + $0x28] sm:$0xff]  ;;  %v1671_v11 = vld [vmem:[%s4637_s1 + $0x338] sm:$0xff] }
   0x4   :  { %2295 = vmatprep.subr.bf16.mxu0 %v2915_v3  ;;  %v2456_v12 = vpack.c.bf16 %v23_v10, %v20_v9  ;;  %v1674_v13 = vld [vmem:[%s4637_s1 + $0x350] sm:$0xff]  ;;  %v74_v14 = vld [vmem:[%s4637_s1 + $0x1c0] sm:$0xff]  ;;  %v77_v15 = vld [vmem:[%s4637_s1 + $0x1d8] sm:$0xff] }
   0x5   :  { %2455 = vmatprep.subr.bf16.mxu1 %v2454_v7  ;;  %2297 = vmatpush1.bf16.msra.mxu0 %v2926_v8  ;;  %v2948_v16 = vpack.c.bf16 %v1674_v13, %v1671_v11  ;;  %v2458_v17 = vpack.c.bf16 %v77_v15, %v74_v14  ;;  %v1670_v18 = vld [vmem:[%s4637_s1 + $0x330] sm:$0xff]  ;;  %v1673_v19 = vld [vmem:[%s4637_s1 + $0x348] sm:$0xff]  ;;  %v26_v20 = vld [vmem:[%s4637_s1 + $0x40] sm:$0xff] }
   0x6   :  { %2457 = vmatpush3.bf16.msra.mxu1 %v2456_v12  ;;  %v2959_v21 = vpack.c.bf16 %v1673_v19, %v1670_v18  ;;  %v29_v22 = vld [vmem:[%s4637_s1 + $0x58] sm:$0xff]  ;;  %v1677_v23 = vld [vmem:[%s4637_s1 + $0x368] sm:$0xff]  ;;  %v1680_v24 = vld [vmem:[%s4637_s1 + $0x380] sm:$0xff] }
   0x7   :  { %2299 = vmatprep.subr.bf16.mxu0 %v2948_v16  ;;  %2459 = vmatprep.subr.bf16.mxu1 %v2458_v17  ;;  %v2460_v25 = vpack.c.bf16 %v29_v22, %v26_v20  ;;  %v2971_v26 = vpack.c.bf16 %v1680_v24, %v1677_v23  ;;  %v80_v27 = vld [vmem:[%s4637_s1 + $0x1f0] sm:$0xff]  ;;  %v83_v28 = vld [vmem:[%s4637_s1 + $0x208] sm:$0xff]  ;;  %v1676_v29 = vld [vmem:[%s4637_s1 + $0x360] sm:$0xff] }
   0x8   :  { %v2462_v30 = vpack.c.bf16 %v83_v28, %v80_v27  ;;  %v1679_v31 = vld [vmem:[%s4637_s1 + $0x378] sm:$0xff]  ;;  %v32_v32 = vld [vmem:[%s4637_s1 + $0x70] sm:$0xff]  ;;  %v35_v33 = vld [vmem:[%s4637_s1 + $0x88] sm:$0xff] }
   0x9   :  { %2301 = vmatpush1.bf16.msra.mxu0 %v2959_v21  ;;  %v2992_v34 = vpack.c.bf16 %v1679_v31, %v1676_v29  ;;  %v1683_v35 = vld [vmem:[%s4637_s1 + $0x398] sm:$0xff]  ;;  %v1686_v36 = vld [vmem:[%s4637_s1 + $0x3b0] sm:$0xff]  ;;  %v86_v37 = vld [vmem:[%s4637_s1 + $0x220] sm:$0xff]  ;;  %v2464_v38 = vpack.c.bf16 %v35_v33, %v32_v32 }
   0xa   :  { %2461 = vmatpush3.bf16.msra.mxu1 %v2460_v25  ;;  %2303 = vmatprep.subr.bf16.mxu0 %v2971_v26  ;;  %v3004_v39 = vpack.c.bf16 %v1686_v36, %v1683_v35  ;;  %v89_v40 = vld [vmem:[%s4637_s1 + $0x238] sm:$0xff]  ;;  %v1682_v41 = vld [vmem:[%s4637_s1 + $0x390] sm:$0xff]  ;;  %v1685_v42 = vld [vmem:[%s4637_s1 + $0x3a8] sm:$0xff] }
   0xb   :  { %2463 = vmatprep.subr.bf16.mxu1 %v2462_v30  ;;  %v2466_v43 = vpack.c.bf16 %v89_v40, %v86_v37  ;;  %v38_v44 = vld [vmem:[%s4637_s1 + $0xa0] sm:$0xff]  ;;  %v41_v45 = vld [vmem:[%s4637_s1 + $0xb8] sm:$0xff]  ;;  %v1689_v46 = vld [vmem:[%s4637_s1 + $0x3c8] sm:$0xff]  ;;  %v3034_v50 = vpack.c.bf16 %v1685_v42, %v1682_v41 }
   0xc   :  { %v1692_v47 = vld [vmem:[%s4637_s1 + $0x3e0] sm:$0xff]  ;;  %v92_v48 = vld [vmem:[%s4637_s1 + $0x250] sm:$0xff]  ;;  %v95_v49 = vld [vmem:[%s4637_s1 + $0x268] sm:$0xff]  ;;  %v2468_v51 = vpack.c.bf16 %v41_v45, %v38_v44 }
   0xd   :  { %2305 = vmatpush1.bf16.msra.mxu0 %v2992_v34  ;;  %v3037_v52 = vpack.c.bf16 %v1692_v47, %v1689_v46  ;;  %v1688_v53 = vld [vmem:[%s4637_s1 + $0x3c0] sm:$0xff]  ;;  %v1691_v54 = vld [vmem:[%s4637_s1 + $0x3d8] sm:$0xff]  ;;  %v44_v55 = vld [vmem:[%s4637_s1 + $0xd0] sm:$0xff]  ;;  %v2470_v56 = vpack.c.bf16 %v95_v49, %v92_v48 }
   0xe   :  { %2465 = vmatpush3.bf16.msra.mxu1 %v2464_v38  ;;  %2307 = vmatprep.subr.bf16.mxu0 %v3004_v39  ;;  %v47_v57 = vld [vmem:[%s4637_s1 + $0xe8] sm:$0xff]  ;;  %v1695_v58 = vld [vmem:[%s4637_s1 + $0x3f8] sm:$0xff]  ;;  %v1698_v59 = vld [vmem:[%s4637_s1 + $0x410] sm:$0xff]  ;;  %v3064_v62 = vpack.c.bf16 %v1691_v54, %v1688_v53 }
   0xf   :  { %2467 = vmatprep.subr.bf16.mxu1 %v2466_v43  ;;  %v98_v60 = vld [vmem:[%s4637_s1 + $0x280] sm:$0xff]  ;;  %v101_v61 = vld [vmem:[%s4637_s1 + $0x298] sm:$0xff]  ;;  %v2472_v63 = vpack.c.bf16 %v47_v57, %v44_v55  ;;  %v3067_v0 = vpack.c.bf16 %v1698_v59, %v1695_v58  ;;  %v1694_v1 = vld [vmem:[%s4637_s1 + $0x3f0] sm:$0xff] }
  0x10   :  { %v1697_v2 = vld [vmem:[%s4637_s1 + $0x408] sm:$0xff]  ;;  %v50_v4 = vld [vmem:[%s4637_s1 + $0x100] sm:$0xff]  ;;  %v2474_v5 = vpack.c.bf16 %v101_v61, %v98_v60  ;;  %v53_v6 = vld [vmem:[%s4637_s1 + $0x118] sm:$0xff] }
  0x11   :  { %2309 = vmatpush1.bf16.msra.mxu0 %v3034_v50  ;;  %v1701_v7 = vld [vmem:[%s4637_s1 + $0x428] sm:$0xff]  ;;  %v1704_v9 = vld [vmem:[%s4637_s1 + $0x440] sm:$0xff]  ;;  %v104_v10 = vld [vmem:[%s4637_s1 + $0x2b0] sm:$0xff]  ;;  %v3094_v12 = vpack.c.bf16 %v1697_v2, %v1694_v1  ;;  %v2476_v14 = vpack.c.bf16 %v53_v6, %v50_v4 }
  0x12   :  { %2469 = vmatpush3.bf16.msra.mxu1 %v2468_v51  ;;  %2311 = vmatprep.subr.bf16.mxu0 %v3037_v52  ;;  %v107_v11 = vld [vmem:[%s4637_s1 + $0x2c8] sm:$0xff]  ;;  %v1700_v13 = vld [vmem:[%s4637_s1 + $0x420] sm:$0xff]  ;;  %v3100_v15 = vpack.c.bf16 %v1704_v9, %v1701_v7  ;;  %v1703_v17 = vld [vmem:[%s4637_s1 + $0x438] sm:$0xff] }
  0x13   :  { %2471 = vmatprep.subr.bf16.mxu1 %v2470_v56  ;;  %v56_v18 = vld [vmem:[%s4637_s1 + $0x130] sm:$0xff]  ;;  %v59_v19 = vld [vmem:[%s4637_s1 + $0x148] sm:$0xff]  ;;  %v2478_v20 = vpack.c.bf16 %v107_v11, %v104_v10  ;;  %v1707_v22 = vld [vmem:[%s4637_s1 + $0x458] sm:$0xff]  ;;  %v3130_v28 = vpack.c.bf16 %v1703_v17, %v1700_v13 }
  0x14   :  { %v1710_v23 = vld [vmem:[%s4637_s1 + $0x470] sm:$0xff]  ;;  %v3120_v24 = vld [vmem:[%s4638_s0 + $0x8] sm:$0xff]  ;;  %v110_v25 = vld [vmem:[%s4637_s1 + $0x2e0] sm:$0xff]  ;;  %v2480_v29 = vpack.c.bf16 %v59_v19, %v56_v18 }
  0x15   :  { %2313 = vmatpush1.bf16.msra.mxu0 %v3064_v62  ;;  %v113_v27 = vld [vmem:[%s4637_s1 + $0x2f8] sm:$0xff]  ;;  %523 = vmatprep.mubr.f32.mxu1 %v3120_v24  ;;  %v3133_v30 = vpack.c.bf16 %v1710_v23, %v1707_v22  ;;  %v1706_v31 = vld [vmem:[%s4637_s1 + $0x450] sm:$0xff]  ;;  %v1709_v32 = vld [vmem:[%s4637_s1 + $0x468] sm:$0xff] }
  0x16   :  { %2473 = vmatpush3.bf16.msra.mxu1 %v2472_v63  ;;  %2315 = vmatprep.subr.bf16.mxu0 %v3067_v0  ;;  %v62_v33 = vld [vmem:[%s4637_s1 + $0x160] sm:$0xff]  ;;  %v2482_v35 = vpack.c.bf16 %v113_v27, %v110_v25  ;;  %v65_v36 = vld [vmem:[%s4637_s1 + $0x178] sm:$0xff]  ;;  %v1713_v37 = vld [vmem:[%s4637_s1 + $0x488] sm:$0xff]  ;;  %v3160_v42 = vpack.c.bf16 %v1709_v32, %v1706_v31 }
  0x17   :  { %2475 = vmatprep.subr.bf16.mxu1 %v2474_v5  ;;  %v1716_v38 = vld [vmem:[%s4637_s1 + $0x4a0] sm:$0xff]  ;;  %v1810_v40 = vld [vmem:[%s4637_s1 + $0x790] sm:$0xff]  ;;  %v1813_v41 = vld [vmem:[%s4637_s1 + $0x7a8] sm:$0xff]  ;;  %v2484_v43 = vpack.c.bf16 %v65_v36, %v62_v33 }
  0x18   :  { %v3163_v44 = vpack.c.bf16 %v1716_v38, %v1713_v37  ;;  %v1712_v45 = vld [vmem:[%s4637_s1 + $0x480] sm:$0xff]  ;;  %v1715_v46 = vld [vmem:[%s4637_s1 + $0x498] sm:$0xff]  ;;  %v1762_v47 = vld [vmem:[%s4637_s1 + $0x610] sm:$0xff]  ;;  %v2550_v48 = vpack.c.bf16 %v1813_v41, %v1810_v40 }
  0x19   :  { %2317 = vmatpush1.bf16.msra.mxu0 %v3094_v12  ;;  %v1765_v49 = vld [vmem:[%s4637_s1 + $0x628] sm:$0xff]  ;;  %v1719_v51 = vld [vmem:[%s4637_s1 + $0x4b8] sm:$0xff]  ;;  %v1722_v53 = vld [vmem:[%s4637_s1 + $0x4d0] sm:$0xff]  ;;  %v3190_v56 = vpack.c.bf16 %v1715_v46, %v1712_v45 }
  0x1a   :  { %2477 = vmatpush3.bf16.msra.mxu1 %v2476_v14  ;;  %2319 = vmatprep.subr.bf16.mxu0 %v3100_v15  ;;  %v1816_v54 = vld [vmem:[%s4637_s1 + $0x7c0] sm:$0xff]  ;;  %v1819_v55 = vld [vmem:[%s4637_s1 + $0x7d8] sm:$0xff]  ;;  %v2552_v58 = vpack.c.bf16 %v1765_v49, %v1762_v47  ;;  %v3198_v59 = vpack.c.bf16 %v1722_v53, %v1719_v51  ;;  %v1718_v60 = vld [vmem:[%s4637_s1 + $0x4b0] sm:$0xff] }
  0x1b   :  { %2479 = vmatprep.subr.bf16.mxu1 %v2478_v20  ;;  %v3195_v57 = vld [vmem:[%s4638_s0] sm:$0xff]  ;;  %v1721_v61 = vld [vmem:[%s4637_s1 + $0x4c8] sm:$0xff]  ;;  %v2554_v1 = vpack.c.bf16 %v1819_v55, %v1816_v54  ;;  %v1771_v2 = vld [vmem:[%s4637_s1 + $0x658] sm:$0xff] }
  0x1c   :  { %v1768_v63 = vld [vmem:[%s4637_s1 + $0x640] sm:$0xff]  ;;  %v1725_v4 = vld [vmem:[%s4637_s1 + $0x4e8] sm:$0xff]  ;;  %v1822_v6 = vld [vmem:[%s4637_s1 + $0x7f0] sm:$0xff]  ;;  %v3226_v9 = vpack.c.bf16 %v1721_v61, %v1718_v60 }
  0x1d   :  { %2321 = vmatpush1.bf16.msra.mxu0 %v3130_v28  ;;  %v1728_v5 = vld [vmem:[%s4637_s1 + $0x500] sm:$0xff]  ;;  %v1825_v7 = vld [vmem:[%s4637_s1 + $0x808] sm:$0xff]  ;;  %v2556_v10 = vpack.c.bf16 %v1771_v2, %v1768_v63  ;;  %v1727_v14 = vld [vmem:[%s4637_s1 + $0x4f8] sm:$0xff] }
  0x1e   :  { %2481 = vmatpush3.bf16.msra.mxu1 %v2480_v29  ;;  %2323 = vmatprep.subr.bf16.mxu0 %v3133_v30  ;;  %v3229_v11 = vpack.c.bf16 %v1728_v5, %v1725_v4  ;;  %v1724_v13 = vld [vmem:[%s4637_s1 + $0x4e0] sm:$0xff]  ;;  %v1774_v17 = vld [vmem:[%s4637_s1 + $0x670] sm:$0xff]  ;;  %v2558_v18 = vpack.c.bf16 %v1825_v7, %v1822_v6  ;;  %v1777_v19 = vld [vmem:[%s4637_s1 + $0x688] sm:$0xff] }
  0x1f   :  { %2483 = vmatprep.subr.bf16.mxu1 %v2482_v35  ;;  %v1731_v20 = vld [vmem:[%s4637_s1 + $0x518] sm:$0xff]  ;;  %v1734_v22 = vld [vmem:[%s4637_s1 + $0x530] sm:$0xff]  ;;  %v1828_v23 = vld [vmem:[%s4637_s1 + $0x820] sm:$0xff]  ;;  %v3256_v27 = vpack.c.bf16 %v1727_v14, %v1724_v13  ;;  %v2560_v32 = vpack.c.bf16 %v1777_v19, %v1774_v17 }
  0x20   :  { %v1831_v25 = vld [vmem:[%s4637_s1 + $0x838] sm:$0xff]  ;;  %v1730_v29 = vld [vmem:[%s4637_s1 + $0x510] sm:$0xff]  ;;  %v1733_v31 = vld [vmem:[%s4637_s1 + $0x528] sm:$0xff]  ;;  %v3265_v33 = vpack.c.bf16 %v1734_v22, %v1731_v20 }
  0x21   :  { %2325 = vmatpush1.bf16.msra.mxu0 %v3160_v42  ;;  %v1780_v35 = vld [vmem:[%s4637_s1 + $0x6a0] sm:$0xff]  ;;  %v1783_v36 = vld [vmem:[%s4637_s1 + $0x6b8] sm:$0xff]  ;;  %v2562_v38 = vpack.c.bf16 %v1831_v25, %v1828_v23  ;;  %v1737_v40 = vld [vmem:[%s4637_s1 + $0x548] sm:$0xff] }
  0x22   :  { %2485 = vmatpush3.bf16.msra.mxu1 %v2484_v43  ;;  %2327 = vmatprep.subr.bf16.mxu0 %v3163_v44  ;;  %v3276_v37 = vld [vmem:[%s4638_s0 + $0x18] sm:$0x3]  ;;  %v1740_v41 = vld [vmem:[%s4637_s1 + $0x560] sm:$0xff]  ;;  %v1834_v43 = vld [vmem:[%s4637_s1 + $0x850] sm:$0xff]  ;;  %v2564_v54 = vpack.c.bf16 %v1783_v36, %v1780_v35 }
  0x23   :  { %2551 = vmatprep.subr.bf16.mxu1 %v2550_v48  ;;  %v1837_v45 = vld [vmem:[%s4637_s1 + $0x868] sm:$0xff]  ;;  %v1736_v46 = vld [vmem:[%s4637_s1 + $0x540] sm:$0xff]  ;;  %v3297_v47 = vld [vmem:[%s4638_s0 + $0x10] sm:$0x3]  ;;  %v3300_v48 = vpack.c.bf16 %v1733_v31, %v1730_v29  ;;  %v3313_v55 = vpack.c.bf16 %v1740_v41, %v1737_v40 }
  0x24   :  { %v1739_v49 = vld [vmem:[%s4637_s1 + $0x558] sm:$0xff]  ;;  %v115_v51 = vld [vmem:[%s4638_s0 + $0x8] sm:$0xfe]  ;;  %v2566_v2 = vpack.c.bf16 %v1837_v45, %v1834_v43  ;;  %v1746_v5 = vld [vmem:[%s4637_s1 + $0x590] sm:$0xff] }
  0x25   :  { %2329 = vmatpush1.bf16.msra.mxu0 %v3190_v56  ;;  %524 = vmatmul.mubr.f32.vlgmr.msra.gmra.mrb[0].mxu1 %v3195_v57  ;;  %v117_v53 = vld [vmem:[%s4638_s0 + $0x18] sm:$0x7]  ;;  %v1789_v60 = vld [vmem:[%s4637_s1 + $0x6e8] sm:$0xff]  ;;  %v223_v61 = vrot.slane %v115_v51, 1  ;;  %v1742_v22 = vld [vmem:[%s4637_s1 + $0x570] sm:$0xff] }
  0x26   :  { %2553 = vmatpush3.bf16.msra.mxu1 %v2552_v58  ;;  %2331 = vmatprep.subr.bf16.mxu0 %v3198_v59  ;;  %v1786_v58 = vld [vmem:[%s4637_s1 + $0x6d0] sm:$0xff]  ;;  %v3321_v63 = vrot.slane %v117_v53, 1  ;;  %v1743_v4 = vld [vmem:[%s4637_s1 + $0x578] sm:$0xff]  ;;  %v1745_v23 = vld [vmem:[%s4637_s1 + $0x588] sm:$0xff] }
  0x27   :  { %2555 = vmatprep.subr.bf16.mxu1 %v2554_v1  ;;  %528 = vmatprep.mubr.f32.mxu1 %v3276_v37  ;;  %v535_v1 = vld [vmem:[%s4638_s0 + $0x8] sm:$0xfc]  ;;  %v537_v6 = vld [vmem:[%s4638_s0 + $0x18] sm:$0xf]  ;;  %v2568_v19 = vpack.c.bf16 %v1789_v60, %v1786_v58  ;;  %v3352_v20 = vpack.c.bf16 %v1746_v5, %v1743_v4  ;;  %v1792_v25 = vld [vmem:[%s4637_s1 + $0x700] sm:$0xff]  ;;  %v3384_v41 = vpack.c.bf16 %v1745_v23, %v1742_v22 }
  0x28   :  { %v643_v7 = vrot.slane %v535_v1, 2  ;;  %v1843_v13 = vld [vmem:[%s4637_s1 + $0x898] sm:$0xff]  ;;  %v3343_v14 = vsel %vm219_vm0, %v223_v61, %v3321_v63  ;;  %v3345_v17 = vrot.slane %v537_v6, 2  ;;  %v1749_v35 = vld [vmem:[%s4637_s1 + $0x5a8] sm:$0xff]  ;;  %v1752_v36 = vld [vmem:[%s4637_s1 + $0x5c0] sm:$0xff] }
  0x29   :  { %2333 = vmatpush1.bf16.msra.mxu0 %v3226_v9  ;;  %529 = vmatmul.mubr.f32.gmra.mrb[2].mxu1 %v3297_v47  ;;  %v1849_v40 = vld [vmem:[%s4637_s1 + $0x8c8] sm:$0xff]  ;;  %v3387_v45 = vpack.c.bf16 %v1752_v36, %v1749_v35  ;;  %v1798_v51 = vld [vmem:[%s4637_s1 + $0x730] sm:$0xff]  ;;  %v1755_v58 = vld [vmem:[%s4637_s1 + $0x5d8] sm:$0xff] }
  0x2a   :  { %2557 = vmatpush3.bf16.msra.mxu1 %v2556_v10  ;;  %2335 = vmatprep.subr.bf16.mxu0 %v3229_v11  ;;  %v1840_v10 = vld [vmem:[%s4637_s1 + $0x880] sm:$0xff]  ;;  %v3365_v29 = vsel %vm639_vm1, %v643_v7, %v3345_v17  ;;  %v1758_v60 = vld [vmem:[%s4637_s1 + $0x5f0] sm:$0xff]  ;;  %v1855_v1 = vld [vmem:[%s4637_s1 + $0x8f8] sm:$0xff] }
  0x2b   :  { %2559 = vmatprep.subr.bf16.mxu1 %v2558_v18  ;;  %v3348_v18 = vpack.c.bf16 %v1739_v49, %v1736_v46  ;;  %294 = vmatprep.mubr.f32.mxu0 %v3343_v14  ;;  %v2570_v31 = vpack.c.bf16 %v1843_v13, %v1840_v10  ;;  %v1748_v46 = vld [vmem:[%s4637_s1 + $0x5a0] sm:$0xff]  ;;  %v1751_v49 = vld [vmem:[%s4637_s1 + $0x5b8] sm:$0xff]  ;;  %v1757_v5 = vld [vmem:[%s4637_s1 + $0x5e8] sm:$0xff]  ;;  %v3429_v13 = vpack.c.bf16 %v1758_v60, %v1755_v58 }
  0x2c   :  { %791 = vmatprep.mubr.f32.mxu1 %v3365_v29  ;;  %v1852_v61 = vld [vmem:[%s4637_s1 + $0x8e0] sm:$0xff]  ;;  %v3417_v4 = vpack.c.bf16 %v1751_v49, %v1748_v46  ;;  %v1807_v7 = vld [vmem:[%s4637_s1 + $0x778] sm:$0xff]  ;;  %v116_v23 = vld [vmem:[%s4638_s0 + $0x10] sm:$0x7] }
  0x2d   :  { %2337 = vmatpush1.bf16.msra.mxu0 %v3256_v27  ;;  %v1804_v6 = vld [vmem:[%s4637_s1 + $0x760] sm:$0xff]  ;;  %v536_v35 = vld [vmem:[%s4638_s0 + $0x10] sm:$0xf]  ;;  %v1723_v60 = vld [vmem:[%s4637_s1 + $0x4d8] sm:$0xff] }
  0x2e   :  { %2561 = vmatpush3.bf16.msra.mxu1 %v2560_v32  ;;  %2339 = vmatprep.subr.bf16.mxu0 %v3265_v33  ;;  %v1795_v32 = vld [vmem:[%s4637_s1 + $0x718] sm:$0xff]  ;;  %v114_v22 = vld [vmem:[%s4638_s0] sm:$0xfe]  ;;  %v1666_v49 = vld [vmem:[%s4637_s1 + $0x310] sm:$0xff] }
  0x2f   :  { %2563 = vmatprep.subr.bf16.mxu1 %v2562_v38  ;;  %v1846_v38 = vld [vmem:[%s4637_s1 + $0x8b0] sm:$0xff]  ;;  %v2572_v43 = vpack.c.bf16 %v1795_v32, %v1792_v25  ;;  %v2578_v25 = vpack.c.bf16 %v1855_v1, %v1852_v61  ;;  %v534_v32 = vld [vmem:[%s4638_s0] sm:$0xfc] }
  0x30   :  { %v2574_v53 = vpack.c.bf16 %v1849_v40, %v1846_v38  ;;  %v220_v38 = vrot.slane %v114_v22, 1  ;;  %v3452_v40 = vrot.slane %v116_v23, 1  ;;  %v1720_v58 = vld [vmem:[%s4637_s1 + $0x4c0] sm:$0xff] }
  0x31   :  { %2341 = vmatpush1.bf16.msra.mxu0 %v3300_v48 }
  0x32   :  { %2565 = vmatpush3.bf16.msra.mxu1 %v2564_v54  ;;  %2343 = vmatprep.subr.bf16.mxu0 %v3313_v55  ;;  %v1801_v54 = vld [vmem:[%s4637_s1 + $0x748] sm:$0xff]  ;;  %v3474_v61 = vsel %vm219_vm0, %v220_v38, %v3452_v40 }
  0x33   :  { %2567 = vmatprep.subr.bf16.mxu1 %v2566_v2  ;;  %v1754_v2 = vld [vmem:[%s4637_s1 + $0x5d0] sm:$0xff]  ;;  %v2576_v10 = vpack.c.bf16 %v1801_v54, %v1798_v51  ;;  %v1669_v51 = vld [vmem:[%s4637_s1 + $0x328] sm:$0xff]  ;;  %v3463_v54 = vrot.slane %v536_v35, 2  ;;  %v1735_v35 = vld [vmem:[%s4637_s1 + $0x538] sm:$0xff] }
  0x34   :  { %v3450_v36 = vpack.c.bf16 %v1757_v5, %v1754_v2  ;;  %v3476_v1 = vpack.c.bf16 %v1669_v51, %v1666_v49  ;;  %v3483_v5 = vpack.c.bf16 %v1723_v60, %v1720_v58  ;;  %v1687_v58 = vld [vmem:[%s4637_s1 + $0x3b8] sm:$0xff] }
  0x35   :  { %2345 = vmatpush1.bf16.msra.mxu0 %v3348_v18 }
  0x36   :  { %2569 = vmatpush3.bf16.msra.mxu1 %v2568_v19  ;;  %2347 = vmatprep.subr.bf16.mxu0 %v3352_v20  ;;  %v1714_v19 = vld [vmem:[%s4637_s1 + $0x490] sm:$0xff] }
  0x37   :  { %2571 = vmatprep.subr.bf16.mxu1 %v2570_v31  ;;  %v1717_v31 = vld [vmem:[%s4637_s1 + $0x4a8] sm:$0xff] }
  0x38   :  { %v3455_v46 = vpack.c.bf16 %v1717_v31, %v1714_v19  ;;  %v1729_v19 = vld [vmem:[%s4637_s1 + $0x508] sm:$0xff] }
  0x39   :  { %2349 = vmatpush1.bf16.msra.mxu0 %v3384_v41  ;;  %v1861_v31 = vld [vmem:[%s4638_s0 + $0x28] sm:$0xfe] }
  0x3a   :  { %2573 = vmatpush3.bf16.msra.mxu1 %v2572_v43  ;;  %2351 = vmatprep.subr.bf16.mxu0 %v3387_v45  ;;  %v2580_v43 = vpack.c.bf16 %v1807_v7, %v1804_v6  ;;  %v1672_v6 = vld [vmem:[%s4637_s1 + $0x340] sm:$0xff]  ;;  %v1675_v7 = vld [vmem:[%s4637_s1 + $0x358] sm:$0xff]  ;;  %v1047_v38 = vrot.slane %v1861_v31, 1  ;;  %v1750_v31 = vld [vmem:[%s4637_s1 + $0x5b0] sm:$0xff] }
  0x3b   :  { %2575 = vmatprep.subr.bf16.mxu1 %v2574_v53  ;;  %v640_v53 = vrot.slane %v534_v32, 2  ;;  %v3501_v22 = vpack.c.bf16 %v1675_v7, %v1672_v6  ;;  %v1863_v32 = vld [vmem:[%s4638_s0 + $0x38] sm:$0x7]  ;;  %v1690_v6 = vld [vmem:[%s4637_s1 + $0x3d0] sm:$0xff]  ;;  %v1693_v7 = vld [vmem:[%s4637_s1 + $0x3e8] sm:$0xff] }
  0x3d   :  { %2353 = vmatpush1.bf16.msra.mxu0 %v3417_v4  ;;  %v3481_v2 = vsel %vm639_vm1, %v640_v53, %v3463_v54  ;;  %v1684_v53 = vld [vmem:[%s4637_s1 + $0x3a0] sm:$0xff] }
  0x3e   :  { %2577 = vmatpush3.bf16.msra.mxu1 %v2576_v10  ;;  %2355 = vmatprep.subr.bf16.mxu0 %v3429_v13  ;;  %v1726_v10 = vld [vmem:[%s4637_s1 + $0x4f0] sm:$0xff]  ;;  %v3559_v60 = vpack.c.bf16 %v1687_v58, %v1684_v53 }
  0x3f   :  { %2579 = vmatprep.subr.bf16.mxu1 %v2578_v25  ;;  %v3508_v23 = vpack.c.bf16 %v1729_v19, %v1726_v10  ;;  %v1681_v25 = vld [vmem:[%s4637_s1 + $0x388] sm:$0xff]  ;;  %v1744_v10 = vld [vmem:[%s4637_s1 + $0x580] sm:$0xff]  ;;  %v3579_v19 = vpack.c.bf16 %v1693_v7, %v1690_v6 }
  0x41   :  { %2357 = vmatpush1.bf16.msra.mxu0 %v3450_v36 }
  0x42   :  { %2581 = vmatpush3.bf16.msra.mxu1 %v2580_v43  ;;  %2359 = vmatprep.subr.bf16.mxu0 %v3455_v46  ;;  %v3527_v43 = vrot.slane %v1863_v32, 1 }
  0x43   :  { %2583 = vmatprep.subr.bf16.mxu1 %v2915_v3  ;;  %v1678_v3 = vld [vmem:[%s4637_s1 + $0x370] sm:$0xff] }
  0x44   :  { %295 = vmatmul.mubr.f32.vlgmr.msra.gmra.mrb[0].mxu0 %v3474_v61  ;;  %v3537_v49 = vsel %vm219_vm0, %v1047_v38, %v3527_v43  ;;  %v1756_v38 = vld [vmem:[%s4637_s1 + $0x5e0] sm:$0xff] }
  0x45   :  { %2361 = vmatpush3.bf16.msra.mxu0 %v3476_v1  ;;  %792 = vmatmul.mubr.f32.vlgmr.msra.gmra.mrb[4].mxu1 %v3481_v2 }
  0x46   :  { %2585 = vmatpush1.bf16.msra.mxu1 %v2926_v8  ;;  %2363 = vmatprep.subr.bf16.mxu0 %v3483_v5  ;;  %v1732_v8 = vld [vmem:[%s4637_s1 + $0x520] sm:$0xff] }
  0x47   :  { %2587 = vmatprep.subr.bf16.mxu1 %v2948_v16  ;;  %300 = vmatprep.mubr.f32.mxu0 %v3321_v63  ;;  %v3532_v16 = vpack.c.bf16 %v1681_v25, %v1678_v3  ;;  %v3541_v51 = vpack.c.bf16 %v1735_v35, %v1732_v8  ;;  %v1699_v25 = vld [vmem:[%s4637_s1 + $0x418] sm:$0xff]  ;;  %v1705_v35 = vld [vmem:[%s4637_s1 + $0x448] sm:$0xff] }
  0x48   :  { %301 = vmatmul.mubr.f32.gmra.mrb[2].mxu0 %v3452_v40  ;;  %796 = vmatprep.mubr.f32.mxu1 %v3345_v17 }
  0x49   :  { %2365 = vmatpush3.bf16.msra.mxu0 %v3501_v22  ;;  %371 = vmatprep.mubr.f32.mxu0 %v3343_v14  ;;  %v1738_v14 = vld [vmem:[%s4637_s1 + $0x550] sm:$0xff] }
  0x4a   :  { %2589 = vmatpush1.bf16.msra.mxu1 %v2959_v21  ;;  %2367 = vmatprep.subr.bf16.mxu0 %v3508_v23  ;;  %v1741_v21 = vld [vmem:[%s4637_s1 + $0x568] sm:$0xff] }
  0x4b   :  { %2591 = vmatprep.subr.bf16.mxu1 %v2971_v26  ;;  %797 = vmatmul.mubr.f32.gmra.mrb[6].mxu1 %v3463_v54  ;;  %v3563_v26 = vpack.c.bf16 %v1741_v21, %v1738_v14  ;;  %v1711_v14 = vld [vmem:[%s4637_s1 + $0x478] sm:$0xff]  ;;  %v19_v21 = vld [vmem:[%s4637_s1 + $0x8] sm:$0xff] }
  0x4c   :  { %1118 = vmatprep.mubr.f32.mxu1 %v3537_v49 }
  0x4d   :  { %2369 = vmatpush3.bf16.msra.mxu0 %v3532_v16 }
  0x4e   :  { %2593 = vmatpush1.bf16.msra.mxu1 %v2992_v34  ;;  %2371 = vmatprep.subr.bf16.mxu0 %v3541_v51  ;;  %v1747_v34 = vld [vmem:[%s4637_s1 + $0x598] sm:$0xff] }
  0x4f   :  { %2595 = vmatprep.subr.bf16.mxu1 %v3004_v39  ;;  %v3583_v3 = vpack.c.bf16 %v1747_v34, %v1744_v10  ;;  %v1696_v39 = vld [vmem:[%s4637_s1 + $0x400] sm:$0xff]  ;;  %v21_v10 = vld [vmem:[%s4637_s1 + $0x18] sm:$0xff] }
  0x50   :  { %v3599_v32 = vpack.c.bf16 %v1699_v25, %v1696_v39  ;;  %v25_v34 = vld [vmem:[%s4637_s1 + $0x38] sm:$0xff] }
  0x51   :  { %2373 = vmatpush3.bf16.msra.mxu0 %v3559_v60 }
  0x52   :  { %2597 = vmatpush1.bf16.msra.mxu1 %v3034_v50  ;;  %2375 = vmatprep.subr.bf16.mxu0 %v3563_v26  ;;  %v1753_v50 = vld [vmem:[%s4637_s1 + $0x5c8] sm:$0xff] }
  0x53   :  { %2599 = vmatprep.subr.bf16.mxu1 %v3037_v52  ;;  %v3603_v8 = vpack.c.bf16 %v1753_v50, %v1750_v31  ;;  %v1702_v52 = vld [vmem:[%s4637_s1 + $0x430] sm:$0xff]  ;;  %v27_v31 = vld [vmem:[%s4637_s1 + $0x48] sm:$0xff] }
  0x54   :  { %v3619_v53 = vpack.c.bf16 %v1705_v35, %v1702_v52  ;;  %v31_v50 = vld [vmem:[%s4637_s1 + $0x68] sm:$0xff]  ;;  %v30_v35 = vld [vmem:[%s4637_s1 + $0x60] sm:$0xff] }
  0x55   :  { %2377 = vmatpush3.bf16.msra.mxu0 %v3579_v19 }
  0x56   :  { %2601 = vmatpush1.bf16.msra.mxu1 %v3064_v62  ;;  %2379 = vmatprep.subr.bf16.mxu0 %v3583_v3  ;;  %v1759_v62 = vld [vmem:[%s4637_s1 + $0x5f8] sm:$0xff] }
  0x57   :  { %2603 = vmatprep.subr.bf16.mxu1 %v3067_v0  ;;  %v3623_v58 = vpack.c.bf16 %v1759_v62, %v1756_v38  ;;  %v1708_v0 = vld [vmem:[%s4637_s1 + $0x460] sm:$0xff]  ;;  %v36_v62 = vld [vmem:[%s4637_s1 + $0x90] sm:$0xff] }
  0x58   :  { %v3639_v6 = vpack.c.bf16 %v1711_v14, %v1708_v0 }
  0x59   :  { %2381 = vmatpush3.bf16.msra.mxu0 %v3599_v32 }
  0x5a   :  { %2605 = vmatpush1.bf16.msra.mxu1 %v3094_v12  ;;  %2383 = vmatprep.subr.bf16.mxu0 %v3603_v8  ;;  %v22_v12 = vld [vmem:[%s4637_s1 + $0x20] sm:$0xff] }
  0x5b   :  { %2607 = vmatprep.subr.bf16.mxu1 %v3100_v15  ;;  %v3643_v7 = vpack.c.bf16 %v22_v12, %v19_v21  ;;  %v18_v15 = vld [vmem:[%s4637_s1] sm:$0xff]  ;;  %v45_v21 = vld [vmem:[%s4637_s1 + $0xd8] sm:$0xff] }
  0x5c   :  { %v3659_v39 = vpack.c.bf16 %v21_v10, %v18_v15  ;;  %v49_v12 = vld [vmem:[%s4637_s1 + $0xf8] sm:$0xff] }
  0x5d   :  { %2385 = vmatpush3.bf16.msra.mxu0 %v3619_v53 }
  0x5e   :  { %2609 = vmatpush1.bf16.msra.mxu1 %v3130_v28  ;;  %2387 = vmatprep.subr.bf16.mxu0 %v3623_v58  ;;  %v28_v28 = vld [vmem:[%s4637_s1 + $0x50] sm:$0xff] }
  0x5f   :  { %2611 = vmatprep.subr.bf16.mxu1 %v3133_v30  ;;  %v3663_v25 = vpack.c.bf16 %v28_v28, %v25_v34  ;;  %v24_v30 = vld [vmem:[%s4637_s1 + $0x30] sm:$0xff]  ;;  %v51_v34 = vld [vmem:[%s4637_s1 + $0x108] sm:$0xff] }
  0x60   :  { %v3681_v52 = vpack.c.bf16 %v27_v31, %v24_v30  ;;  %v55_v28 = vld [vmem:[%s4637_s1 + $0x128] sm:$0xff] }
  0x61   :  { %2389 = vmatpush3.bf16.msra.mxu0 %v3639_v6 }
  0x62   :  { %2613 = vmatpush1.bf16.msra.mxu1 %v3160_v42  ;;  %2391 = vmatprep.subr.bf16.mxu0 %v3643_v7  ;;  %v34_v42 = vld [vmem:[%s4637_s1 + $0x80] sm:$0xff] }
  0x63   :  { %2615 = vmatprep.subr.bf16.mxu1 %v3163_v44  ;;  %v3685_v44 = vpack.c.bf16 %v34_v42, %v31_v50  ;;  %v57_v50 = vld [vmem:[%s4637_s1 + $0x138] sm:$0xff] }
  0x64   :  { %372 = vmatmul.mubr.f32.vlgmr.msra.gmra.mrb[4].mxu0 %v3474_v61  ;;  %v33_v61 = vld [vmem:[%s4637_s1 + $0x78] sm:$0xff] }
  0x65   :  { %2393 = vmatpush1.bf16.msra.mxu0 %v3659_v39  ;;  %376 = vmatprep.mubr.f32.mxu0 %v3321_v63  ;;  %v37_v63 = vld [vmem:[%s4637_s1 + $0x98] sm:$0xff]  ;;  %v3702_v38 = vpack.c.bf16 %v33_v61, %v30_v35 }
  0x66   :  { %2617 = vmatpush1.bf16.msra.mxu1 %v3190_v56  ;;  %2395 = vmatprep.subr.bf16.mxu0 %v3663_v25  ;;  %v40_v56 = vld [vmem:[%s4637_s1 + $0xb0] sm:$0xff]  ;;  %v61_v42 = vld [vmem:[%s4637_s1 + $0x158] sm:$0xff] }
  0x67   :  { %2619 = vmatprep.subr.bf16.mxu1 %v3198_v59  ;;  %v3707_v59 = vpack.c.bf16 %v40_v56, %v37_v63  ;;  %v63_v63 = vld [vmem:[%s4637_s1 + $0x168] sm:$0xff] }
  0x68   :  { %377 = vmatmul.mubr.f32.gmra.mrb[6].mxu0 %v3452_v40  ;;  %v39_v40 = vld [vmem:[%s4637_s1 + $0xa8] sm:$0xff] }
  0x69   :  { %2397 = vmatpush1.bf16.msra.mxu0 %v3681_v52  ;;  %446 = vmatprep.mubr.f32.mxu0 %v3120_v24  ;;  %v43_v24 = vld [vmem:[%s4637_s1 + $0xc8] sm:$0xff]  ;;  %v3723_v0 = vpack.c.bf16 %v39_v40, %v36_v62  ;;  %v1860_v62 = vld [vmem:[%s4638_s0 + $0x20] sm:$0xfe]  ;;  %v1862_v40 = vld [vmem:[%s4638_s0 + $0x30] sm:$0x7] }
  0x6a   :  { %2621 = vmatpush1.bf16.msra.mxu1 %v3226_v9  ;;  %2399 = vmatprep.subr.bf16.mxu0 %v3685_v44  ;;  %v46_v9 = vld [vmem:[%s4637_s1 + $0xe0] sm:$0xff]  ;;  %v67_v56 = vld [vmem:[%s4637_s1 + $0x188] sm:$0xff] }
  0x6b   :  { %2623 = vmatprep.subr.bf16.mxu1 %v3229_v11  ;;  %v3727_v14 = vpack.c.bf16 %v46_v9, %v43_v24  ;;  %v42_v11 = vld [vmem:[%s4637_s1 + $0xc0] sm:$0xff] }
  0x6c   :  { %v3743_v15 = vpack.c.bf16 %v45_v21, %v42_v11  ;;  %v66_v9 = vld [vmem:[%s4637_s1 + $0x180] sm:$0xff]  ;;  %v69_v11 = vld [vmem:[%s4637_s1 + $0x198] sm:$0xff]  ;;  %v1044_v21 = vrot.slane %v1860_v62, 1  ;;  %v91_v62 = vld [vmem:[%s4637_s1 + $0x248] sm:$0xff] }
  0x6d   :  { %2401 = vmatpush1.bf16.msra.mxu0 %v3702_v38 }
  0x6e   :  { %2625 = vmatpush1.bf16.msra.mxu1 %v3256_v27  ;;  %2403 = vmatprep.subr.bf16.mxu0 %v3707_v59  ;;  %v52_v27 = vld [vmem:[%s4637_s1 + $0x110] sm:$0xff] }
  0x6f   :  { %2627 = vmatprep.subr.bf16.mxu1 %v3265_v33  ;;  %v3747_v10 = vpack.c.bf16 %v52_v27, %v49_v12  ;;  %v48_v33 = vld [vmem:[%s4637_s1 + $0xf0] sm:$0xff]  ;;  %v3821_v12 = vrot.slane %v1862_v40, 1 }
  0x70   :  { %v3763_v30 = vpack.c.bf16 %v51_v34, %v48_v33  ;;  %v76_v27 = vld [vmem:[%s4637_s1 + $0x1d0] sm:$0xff]  ;;  %v3831_v33 = vpack.c.bf16 %v69_v11, %v66_v9  ;;  %v93_v11 = vld [vmem:[%s4637_s1 + $0x258] sm:$0xff] }
  0x71   :  { %2405 = vmatpush1.bf16.msra.mxu0 %v3723_v0  ;;  %v3837_v34 = vsel %vm219_vm0, %v1044_v21, %v3821_v12 }
  0x72   :  { %2629 = vmatpush1.bf16.msra.mxu1 %v3300_v48  ;;  %2407 = vmatprep.subr.bf16.mxu0 %v3727_v14  ;;  %v58_v48 = vld [vmem:[%s4637_s1 + $0x140] sm:$0xff] }
  0x73   :  { %2631 = vmatprep.subr.bf16.mxu1 %v3313_v55  ;;  %v3767_v31 = vpack.c.bf16 %v58_v48, %v55_v28  ;;  %v54_v55 = vld [vmem:[%s4637_s1 + $0x120] sm:$0xff]  ;;  %v72_v28 = vld [vmem:[%s4637_s1 + $0x1b0] sm:$0xff]  ;;  %v75_v48 = vld [vmem:[%s4637_s1 + $0x1c8] sm:$0xff] }
  0x74   :  { %v3783_v35 = vpack.c.bf16 %v57_v50, %v54_v55  ;;  %v82_v55 = vld [vmem:[%s4637_s1 + $0x200] sm:$0xff]  ;;  %v3856_v50 = vpack.c.bf16 %v75_v48, %v72_v28  ;;  %v103_v28 = vld [vmem:[%s4637_s1 + $0x2a8] sm:$0xff] }
  0x75   :  { %2409 = vmatpush1.bf16.msra.mxu0 %v3743_v15 }
  0x76   :  { %2633 = vmatpush1.bf16.msra.mxu1 %v3348_v18  ;;  %2411 = vmatprep.subr.bf16.mxu0 %v3747_v10  ;;  %v64_v18 = vld [vmem:[%s4637_s1 + $0x170] sm:$0xff] }
  0x77   :  { %2635 = vmatprep.subr.bf16.mxu1 %v3352_v20  ;;  %v3787_v61 = vpack.c.bf16 %v64_v18, %v61_v42  ;;  %v60_v20 = vld [vmem:[%s4637_s1 + $0x150] sm:$0xff]  ;;  %v81_v18 = vld [vmem:[%s4637_s1 + $0x1f8] sm:$0xff] }
  0x78   :  { %v3809_v24 = vpack.c.bf16 %v63_v63, %v60_v20  ;;  %v85_v20 = vld [vmem:[%s4637_s1 + $0x218] sm:$0xff] }
  0x79   :  { %2413 = vmatpush1.bf16.msra.mxu0 %v3763_v30 }
  0x7a   :  { %2637 = vmatpush1.bf16.msra.mxu1 %v3384_v41  ;;  %2415 = vmatprep.subr.bf16.mxu0 %v3767_v31  ;;  %v70_v41 = vld [vmem:[%s4637_s1 + $0x1a0] sm:$0xff] }
  0x7b   :  { %2639 = vmatprep.subr.bf16.mxu1 %v3387_v45  ;;  %v3813_v45 = vpack.c.bf16 %v70_v41, %v67_v56  ;;  %v84_v56 = vld [vmem:[%s4637_s1 + $0x210] sm:$0xff]  ;;  %v87_v41 = vld [vmem:[%s4637_s1 + $0x228] sm:$0xff] }
  0x7c   :  { %v3899_v40 = vpack.c.bf16 %v87_v41, %v84_v56  ;;  %v1761_v56 = vld [vmem:[%s4637_s1 + $0x608] sm:$0xff] }
  0x7d   :  { %2417 = vmatpush1.bf16.msra.mxu0 %v3783_v35 }
  0x7e   :  { %2641 = vmatpush1.bf16.msra.mxu1 %v3417_v4  ;;  %2419 = vmatprep.subr.bf16.mxu0 %v3787_v61  ;;  %v73_v4 = vld [vmem:[%s4637_s1 + $0x1b8] sm:$0xff] }
  0x7f   :  { %2643 = vmatprep.subr.bf16.mxu1 %v3429_v13  ;;  %v3839_v13 = vpack.c.bf16 %v76_v27, %v73_v4  ;;  %v99_v27 = vld [vmem:[%s4637_s1 + $0x288] sm:$0xff] }
  0x81   :  { %2421 = vmatpush1.bf16.msra.mxu0 %v3809_v24 }
  0x82   :  { %2645 = vmatpush1.bf16.msra.mxu1 %v3450_v36  ;;  %2423 = vmatprep.subr.bf16.mxu0 %v3813_v45  ;;  %v79_v36 = vld [vmem:[%s4637_s1 + $0x1e8] sm:$0xff] }
  0x83   :  { %2647 = vmatprep.subr.bf16.mxu1 %v3455_v46  ;;  %v3860_v42 = vpack.c.bf16 %v82_v55, %v79_v36  ;;  %v78_v46 = vld [vmem:[%s4637_s1 + $0x1e0] sm:$0xff]  ;;  %v105_v55 = vld [vmem:[%s4637_s1 + $0x2b8] sm:$0xff] }
  0x84   :  { %v3877_v63 = vpack.c.bf16 %v81_v18, %v78_v46  ;;  %v109_v46 = vld [vmem:[%s4637_s1 + $0x2d8] sm:$0xff] }
  0x85   :  { %2425 = vmatpush1.bf16.msra.mxu0 %v3831_v33  ;;  %1119 = vmatmul.mubr.f32.vlgmr.msra.gmra.mrb[8].mxu1 %v3837_v34 }
  0x86   :  { %2649 = vmatpush3.bf16.msra.mxu1 %v3476_v1  ;;  %2427 = vmatprep.subr.bf16.mxu0 %v3839_v13  ;;  %v88_v1 = vld [vmem:[%s4637_s1 + $0x230] sm:$0xff] }
  0x87   :  { %2651 = vmatprep.subr.bf16.mxu1 %v3483_v5  ;;  %1124 = vmatprep.mubr.f32.mxu1 %v3527_v43  ;;  %v3882_v5 = vpack.c.bf16 %v88_v1, %v85_v20  ;;  %v111_v1 = vld [vmem:[%s4637_s1 + $0x2e8] sm:$0xff] }
  0x89   :  { %2429 = vmatpush1.bf16.msra.mxu0 %v3856_v50  ;;  %1125 = vmatmul.mubr.f32.gmra.mrb[10].mxu1 %v3821_v12 }
  0x8a   :  { %2653 = vmatpush3.bf16.msra.mxu1 %v3501_v22  ;;  %2431 = vmatprep.subr.bf16.mxu0 %v3860_v42  ;;  %v94_v22 = vld [vmem:[%s4637_s1 + $0x260] sm:$0xff] }
  0x8b   :  { %2655 = vmatprep.subr.bf16.mxu1 %v3508_v23  ;;  %1195 = vmatprep.mubr.f32.mxu1 %v3537_v49  ;;  %v3903_v9 = vpack.c.bf16 %v94_v22, %v91_v62  ;;  %v90_v23 = vld [vmem:[%s4637_s1 + $0x240] sm:$0xff]  ;;  %v97_v49 = vld [vmem:[%s4637_s1 + $0x278] sm:$0xff] }
  0x8c   :  { %v3919_v21 = vpack.c.bf16 %v93_v11, %v90_v23  ;;  %v1763_v22 = vld [vmem:[%s4637_s1 + $0x618] sm:$0xff] }
  0x8d   :  { %2433 = vmatpush1.bf16.msra.mxu0 %v3877_v63  ;;  %v1767_v23 = vld [vmem:[%s4637_s1 + $0x638] sm:$0xff] }
  0x8e   :  { %2657 = vmatpush3.bf16.msra.mxu1 %v3532_v16  ;;  %2435 = vmatprep.subr.bf16.mxu0 %v3882_v5  ;;  %v100_v16 = vld [vmem:[%s4637_s1 + $0x290] sm:$0xff] }
  0x8f   :  { %2659 = vmatprep.subr.bf16.mxu1 %v3541_v51  ;;  %v3923_v4 = vpack.c.bf16 %v100_v16, %v97_v49  ;;  %v96_v51 = vld [vmem:[%s4637_s1 + $0x270] sm:$0xff]  ;;  %v1769_v16 = vld [vmem:[%s4637_s1 + $0x648] sm:$0xff] }
  0x90   :  { %v3939_v48 = vpack.c.bf16 %v99_v27, %v96_v51  ;;  %v1773_v51 = vld [vmem:[%s4637_s1 + $0x668] sm:$0xff] }
  0x91   :  { %2437 = vmatpush1.bf16.msra.mxu0 %v3899_v40 }
  0x92   :  { %2661 = vmatpush3.bf16.msra.mxu1 %v3559_v60  ;;  %2439 = vmatprep.subr.bf16.mxu0 %v3903_v9  ;;  %v106_v60 = vld [vmem:[%s4637_s1 + $0x2c0] sm:$0xff] }
  0x93   :  { %2663 = vmatprep.subr.bf16.mxu1 %v3563_v26  ;;  %v3943_v36 = vpack.c.bf16 %v106_v60, %v103_v28  ;;  %v102_v26 = vld [vmem:[%s4637_s1 + $0x2a0] sm:$0xff] }
  0x94   :  { %v3959_v18 = vpack.c.bf16 %v105_v55, %v102_v26  ;;  %v1772_v28 = vld [vmem:[%s4637_s1 + $0x660] sm:$0xff] }
  0x95   :  { %2441 = vmatpush1.bf16.msra.mxu0 %v3919_v21  ;;  %v1784_v55 = vld [vmem:[%s4637_s1 + $0x6c0] sm:$0xff] }
  0x96   :  { %2665 = vmatpush3.bf16.msra.mxu1 %v3579_v19  ;;  %2443 = vmatprep.subr.bf16.mxu0 %v3923_v4  ;;  %v112_v19 = vld [vmem:[%s4637_s1 + $0x2f0] sm:$0xff] }
  0x97   :  { %2667 = vmatprep.subr.bf16.mxu1 %v3583_v3  ;;  %v3963_v20 = vpack.c.bf16 %v112_v19, %v109_v46  ;;  %v108_v3 = vld [vmem:[%s4637_s1 + $0x2d0] sm:$0xff]  ;;  %v1791_v46 = vld [vmem:[%s4637_s1 + $0x6f8] sm:$0xff] }
  0x98   :  { %v3979_v41 = vpack.c.bf16 %v111_v1, %v108_v3  ;;  %v1793_v1 = vld [vmem:[%s4637_s1 + $0x708] sm:$0xff] }
  0x99   :  { %2445 = vmatpush1.bf16.msra.mxu0 %v3939_v48 }
  0x9a   :  { %2669 = vmatpush3.bf16.msra.mxu1 %v3599_v32  ;;  %2447 = vmatprep.subr.bf16.mxu0 %v3943_v36  ;;  %v1764_v32 = vld [vmem:[%s4637_s1 + $0x620] sm:$0xff] }
  0x9b   :  { %2671 = vmatprep.subr.bf16.mxu1 %v3603_v8  ;;  %v3983_v62 = vpack.c.bf16 %v1764_v32, %v1761_v56  ;;  %v1760_v8 = vld [vmem:[%s4637_s1 + $0x600] sm:$0xff]  ;;  %v1797_v56 = vld [vmem:[%s4637_s1 + $0x728] sm:$0xff] }
  0x9c   :  { %v3999_v11 = vpack.c.bf16 %v1763_v22, %v1760_v8  ;;  %v1799_v22 = vld [vmem:[%s4637_s1 + $0x738] sm:$0xff] }
  0x9d   :  { %2449 = vmatpush1.bf16.msra.mxu0 %v3959_v18 }
  0x9e   :  { %2673 = vmatpush3.bf16.msra.mxu1 %v3619_v53  ;;  %2451 = vmatprep.subr.bf16.mxu0 %v3963_v20  ;;  %v1770_v53 = vld [vmem:[%s4637_s1 + $0x650] sm:$0xff] }
  0x9f   :  { %2675 = vmatprep.subr.bf16.mxu1 %v3623_v58  ;;  %v4003_v49 = vpack.c.bf16 %v1770_v53, %v1767_v23  ;;  %v1766_v58 = vld [vmem:[%s4637_s1 + $0x630] sm:$0xff]  ;;  %v1803_v23 = vld [vmem:[%s4637_s1 + $0x758] sm:$0xff] }
  0xa0   :  { %v4021_v27 = vpack.c.bf16 %v1769_v16, %v1766_v58  ;;  %v1805_v16 = vld [vmem:[%s4637_s1 + $0x768] sm:$0xff] }
  0xa1   :  { %2453 = vmatpush1.bf16.msra.mxu0 %v3979_v41 }
  0xa2   :  { %2677 = vmatpush3.bf16.msra.mxu1 %v3639_v6  ;;  %2487 = vmatprep.subr.bf16.mxu0 %v3983_v62  ;;  %v1776_v6 = vld [vmem:[%s4637_s1 + $0x680] sm:$0xff] }
  0xa3   :  { %2679 = vmatprep.subr.bf16.mxu1 %v3643_v7  ;;  %v4025_v7 = vpack.c.bf16 %v1776_v6, %v1773_v51  ;;  %v1809_v51 = vld [vmem:[%s4637_s1 + $0x788] sm:$0xff] }
  0xa4   :  { %447 = vmatmul.mubr.f32.vlgmr.msra.gmra.mrb[0].mxu0 %v3195_v57  ;;  %v1775_v57 = vld [vmem:[%s4637_s1 + $0x678] sm:$0xff] }
  0xa5   :  { %2489 = vmatpush1.bf16.msra.mxu0 %v3999_v11  ;;  %1196 = vmatmul.mubr.f32.vlgmr.msra.gmra.mrb[12].mxu1 %v3837_v34  ;;  %v1779_v34 = vld [vmem:[%s4637_s1 + $0x698] sm:$0xff]  ;;  %v4044_v60 = vpack.c.bf16 %v1775_v57, %v1772_v28 }
  0xa6   :  { %2681 = vmatpush1.bf16.msra.mxu1 %v3659_v39  ;;  %2491 = vmatprep.subr.bf16.mxu0 %v4003_v49  ;;  %v1782_v39 = vld [vmem:[%s4637_s1 + $0x6b0] sm:$0xff]  ;;  %v1811_v57 = vld [vmem:[%s4637_s1 + $0x798] sm:$0xff] }
  0xa7   :  { %2683 = vmatprep.subr.bf16.mxu1 %v3663_v25  ;;  %452 = vmatprep.mubr.f32.mxu0 %v3276_v37  ;;  %v4050_v25 = vld [vmem:[%s4638_s0 + $0x28] sm:$0xff]  ;;  %v4054_v37 = vpack.c.bf16 %v1782_v39, %v1779_v34  ;;  %v1815_v34 = vld [vmem:[%s4637_s1 + $0x7b8] sm:$0xff] }
  0xa8   :  { %453 = vmatmul.mubr.f32.gmra.mrb[2].mxu0 %v3297_v47  ;;  %1200 = vmatprep.mubr.f32.mxu1 %v3527_v43  ;;  %v1778_v47 = vld [vmem:[%s4637_s1 + $0x690] sm:$0xff]  ;;  %v1781_v43 = vld [vmem:[%s4637_s1 + $0x6a8] sm:$0xff] }
  0xa9   :  { %2493 = vmatpush1.bf16.msra.mxu0 %v4021_v27  ;;  %1201 = vmatmul.mubr.f32.gmra.mrb[14].mxu1 %v3821_v12  ;;  %v1785_v12 = vld [vmem:[%s4637_s1 + $0x6c8] sm:$0xff]  ;;  %v4072_v26 = vpack.c.bf16 %v1781_v43, %v1778_v47 }
  0xaa   :  { %2685 = vmatpush1.bf16.msra.mxu1 %v3681_v52  ;;  %2495 = vmatprep.subr.bf16.mxu0 %v4025_v7  ;;  %v1788_v52 = vld [vmem:[%s4637_s1 + $0x6e0] sm:$0xff]  ;;  %v1817_v43 = vld [vmem:[%s4637_s1 + $0x7c8] sm:$0xff] }
  0xab   :  { %2687 = vmatprep.subr.bf16.mxu1 %v3685_v44  ;;  %714 = vmatprep.mubr.f32.mxu0 %v3365_v29  ;;  %v4076_v44 = vpack.c.bf16 %v1788_v52, %v1785_v12  ;;  %v1787_v29 = vld [vmem:[%s4637_s1 + $0x6d8] sm:$0xff]  ;;  %v1821_v12 = vld [vmem:[%s4637_s1 + $0x7e8] sm:$0xff] }
  0xac   :  { %1270 = vmatprep.mubr.f32.mxu1 %v4050_v25  ;;  %v4092_v19 = vpack.c.bf16 %v1787_v29, %v1784_v55  ;;  %v1823_v29 = vld [vmem:[%s4637_s1 + $0x7f8] sm:$0xff] }
  0xad   :  { %2497 = vmatpush1.bf16.msra.mxu0 %v4044_v60 }
  0xae   :  { %2689 = vmatpush1.bf16.msra.mxu1 %v3702_v38  ;;  %2499 = vmatprep.subr.bf16.mxu0 %v4054_v37  ;;  %v1794_v38 = vld [vmem:[%s4637_s1 + $0x710] sm:$0xff] }
  0xaf   :  { %2691 = vmatprep.subr.bf16.mxu1 %v3707_v59  ;;  %v4096_v3 = vpack.c.bf16 %v1794_v38, %v1791_v46  ;;  %v1790_v59 = vld [vmem:[%s4637_s1 + $0x6f0] sm:$0xff]  ;;  %v1827_v46 = vld [vmem:[%s4637_s1 + $0x818] sm:$0xff] }
  0xb0   :  { %v4112_v32 = vpack.c.bf16 %v1793_v1, %v1790_v59  ;;  %v1829_v1 = vld [vmem:[%s4637_s1 + $0x828] sm:$0xff] }
  0xb1   :  { %2501 = vmatpush1.bf16.msra.mxu0 %v4072_v26 }
  0xb2   :  { %2693 = vmatpush1.bf16.msra.mxu1 %v3723_v0  ;;  %2503 = vmatprep.subr.bf16.mxu0 %v4076_v44  ;;  %v1800_v0 = vld [vmem:[%s4637_s1 + $0x740] sm:$0xff] }
  0xb3   :  { %2695 = vmatprep.subr.bf16.mxu1 %v3727_v14  ;;  %v4116_v8 = vpack.c.bf16 %v1800_v0, %v1797_v56  ;;  %v1796_v14 = vld [vmem:[%s4637_s1 + $0x720] sm:$0xff]  ;;  %v1833_v56 = vld [vmem:[%s4637_s1 + $0x848] sm:$0xff] }
  0xb4   :  { %v4132_v53 = vpack.c.bf16 %v1799_v22, %v1796_v14  ;;  %v1835_v22 = vld [vmem:[%s4637_s1 + $0x858] sm:$0xff] }
  0xb5   :  { %2505 = vmatpush1.bf16.msra.mxu0 %v4092_v19 }
  0xb6   :  { %2697 = vmatpush1.bf16.msra.mxu1 %v3743_v15  ;;  %2507 = vmatprep.subr.bf16.mxu0 %v4096_v3  ;;  %v1806_v15 = vld [vmem:[%s4637_s1 + $0x770] sm:$0xff] }
  0xb7   :  { %2699 = vmatprep.subr.bf16.mxu1 %v3747_v10  ;;  %v4136_v58 = vpack.c.bf16 %v1806_v15, %v1803_v23  ;;  %v1802_v10 = vld [vmem:[%s4637_s1 + $0x750] sm:$0xff]  ;;  %v1839_v23 = vld [vmem:[%s4637_s1 + $0x878] sm:$0xff] }
  0xb8   :  { %v4152_v6 = vpack.c.bf16 %v1805_v16, %v1802_v10  ;;  %v1841_v16 = vld [vmem:[%s4637_s1 + $0x888] sm:$0xff] }
  0xb9   :  { %2509 = vmatpush1.bf16.msra.mxu0 %v4112_v32 }
  0xba   :  { %2701 = vmatpush1.bf16.msra.mxu1 %v3763_v30  ;;  %2511 = vmatprep.subr.bf16.mxu0 %v4116_v8  ;;  %v1812_v30 = vld [vmem:[%s4637_s1 + $0x7a0] sm:$0xff] }
  0xbb   :  { %2703 = vmatprep.subr.bf16.mxu1 %v3767_v31  ;;  %v4156_v28 = vpack.c.bf16 %v1812_v30, %v1809_v51  ;;  %v1808_v31 = vld [vmem:[%s4637_s1 + $0x780] sm:$0xff]  ;;  %v1845_v51 = vld [vmem:[%s4637_s1 + $0x8a8] sm:$0xff] }
  0xbc   :  { %v4172_v39 = vpack.c.bf16 %v1811_v57, %v1808_v31  ;;  %v1847_v57 = vld [vmem:[%s4637_s1 + $0x8b8] sm:$0xff] }
  0xbd   :  { %2513 = vmatpush1.bf16.msra.mxu0 %v4132_v53 }
  0xbe   :  { %2705 = vmatpush1.bf16.msra.mxu1 %v3783_v35  ;;  %2515 = vmatprep.subr.bf16.mxu0 %v4136_v58  ;;  %v1818_v35 = vld [vmem:[%s4637_s1 + $0x7d0] sm:$0xff] }
  0xbf   :  { %2707 = vmatprep.subr.bf16.mxu1 %v3787_v61  ;;  %v4176_v47 = vpack.c.bf16 %v1818_v35, %v1815_v34  ;;  %v1814_v61 = vld [vmem:[%s4637_s1 + $0x7b0] sm:$0xff]  ;;  %v1851_v34 = vld [vmem:[%s4637_s1 + $0x8d8] sm:$0xff] }
  0xc0   :  { %v4192_v52 = vpack.c.bf16 %v1817_v43, %v1814_v61  ;;  %v1853_v43 = vld [vmem:[%s4637_s1 + $0x8e8] sm:$0xff] }
  0xc1   :  { %2517 = vmatpush1.bf16.msra.mxu0 %v4152_v6 }
  0xc2   :  { %2709 = vmatpush1.bf16.msra.mxu1 %v3809_v24  ;;  %2519 = vmatprep.subr.bf16.mxu0 %v4156_v28  ;;  %v1824_v24 = vld [vmem:[%s4637_s1 + $0x800] sm:$0xff] }
  0xc3   :  { %2711 = vmatprep.subr.bf16.mxu1 %v3813_v45  ;;  %v4196_v55 = vpack.c.bf16 %v1824_v24, %v1821_v12  ;;  %v1820_v45 = vld [vmem:[%s4637_s1 + $0x7e0] sm:$0xff]  ;;  %v894_v12 = vld [vmem:[%s4637_s1 + $0x190] sm:$0xff] }
  0xc4   :  { %v4212_v38 = vpack.c.bf16 %v1823_v29, %v1820_v45  ;;  %v849_v29 = vld [vmem:[%s4637_s1 + $0x28] sm:$0xff] }
  0xc5   :  { %2521 = vmatpush1.bf16.msra.mxu0 %v4172_v39 }
  0xc6   :  { %2713 = vmatpush1.bf16.msra.mxu1 %v3831_v33  ;;  %2523 = vmatprep.subr.bf16.mxu0 %v4176_v47  ;;  %v1830_v33 = vld [vmem:[%s4637_s1 + $0x830] sm:$0xff] }
  0xc7   :  { %2715 = vmatprep.subr.bf16.mxu1 %v3839_v13  ;;  %v4216_v59 = vpack.c.bf16 %v1830_v33, %v1827_v46  ;;  %v1826_v13 = vld [vmem:[%s4637_s1 + $0x810] sm:$0xff]  ;;  %v900_v46 = vld [vmem:[%s4637_s1 + $0x1c0] sm:$0xff] }
  0xc8   :  { %v4232_v0 = vpack.c.bf16 %v1829_v1, %v1826_v13  ;;  %v4333_v33 = vld [vmem:[%s4638_s0 + $0x20] sm:$0xff]  ;;  %v855_v1 = vld [vmem:[%s4637_s1 + $0x58] sm:$0xff] }
  0xc9   :  { %2525 = vmatpush1.bf16.msra.mxu0 %v4192_v52 }
  0xca   :  { %2717 = vmatpush1.bf16.msra.mxu1 %v3856_v50  ;;  %2527 = vmatprep.subr.bf16.mxu0 %v4196_v55  ;;  %v1836_v50 = vld [vmem:[%s4637_s1 + $0x860] sm:$0xff] }
  0xcb   :  { %2719 = vmatprep.subr.bf16.mxu1 %v3860_v42  ;;  %v4236_v14 = vpack.c.bf16 %v1836_v50, %v1833_v56  ;;  %v1832_v42 = vld [vmem:[%s4637_s1 + $0x840] sm:$0xff]  ;;  %v1961_v56 = vld [vmem:[%s4638_s0 + $0x28] sm:$0xfc]  ;;  %v1963_v50 = vld [vmem:[%s4638_s0 + $0x38] sm:$0xf] }
  0xcc   :  { %v4252_v15 = vpack.c.bf16 %v1835_v22, %v1832_v42  ;;  %v909_v22 = vld [vmem:[%s4637_s1 + $0x208] sm:$0xff] }
  0xcd   :  { %2529 = vmatpush1.bf16.msra.mxu0 %v4212_v38 }
  0xce   :  { %2721 = vmatpush1.bf16.msra.mxu1 %v3877_v63  ;;  %2531 = vmatprep.subr.bf16.mxu0 %v4216_v59  ;;  %v1842_v63 = vld [vmem:[%s4637_s1 + $0x890] sm:$0xff] }
  0xcf   :  { %2723 = vmatprep.subr.bf16.mxu1 %v3882_v5  ;;  %v4256_v10 = vpack.c.bf16 %v1842_v63, %v1839_v23  ;;  %v1838_v5 = vld [vmem:[%s4637_s1 + $0x870] sm:$0xff]  ;;  %v1465_v63 = vrot.slane %v1961_v56, 2 }
  0xd0   :  { %v4272_v30 = vpack.c.bf16 %v1841_v16, %v1838_v5  ;;  %v4357_v5 = vrot.slane %v1963_v50, 2  ;;  %v858_v16 = vld [vmem:[%s4637_s1 + $0x70] sm:$0xff] }
  0xd1   :  { %2533 = vmatpush1.bf16.msra.mxu0 %v4232_v0 }
  0xd2   :  { %2725 = vmatpush1.bf16.msra.mxu1 %v3899_v40  ;;  %2535 = vmatprep.subr.bf16.mxu0 %v4236_v14  ;;  %v1848_v40 = vld [vmem:[%s4637_s1 + $0x8c0] sm:$0xff] }
  0xd3   :  { %2727 = vmatprep.subr.bf16.mxu1 %v3903_v9  ;;  %v4276_v31 = vpack.c.bf16 %v1848_v40, %v1845_v51  ;;  %v1844_v9 = vld [vmem:[%s4637_s1 + $0x8a0] sm:$0xff] }
  0xd4   :  { %v4292_v35 = vpack.c.bf16 %v1847_v57, %v1844_v9  ;;  %v912_v51 = vld [vmem:[%s4637_s1 + $0x220] sm:$0xff] }
  0xd5   :  { %2537 = vmatpush1.bf16.msra.mxu0 %v4252_v15  ;;  %v864_v57 = vld [vmem:[%s4637_s1 + $0xa0] sm:$0xff] }
  0xd6   :  { %2729 = vmatpush1.bf16.msra.mxu1 %v3919_v21  ;;  %2539 = vmatprep.subr.bf16.mxu0 %v4256_v10  ;;  %v1854_v21 = vld [vmem:[%s4637_s1 + $0x8f0] sm:$0xff] }
  0xd7   :  { %2731 = vmatprep.subr.bf16.mxu1 %v3923_v4  ;;  %v4296_v61 = vpack.c.bf16 %v1854_v21, %v1851_v34  ;;  %v1850_v4 = vld [vmem:[%s4637_s1 + $0x8d0] sm:$0xff]  ;;  %v921_v34 = vld [vmem:[%s4637_s1 + $0x268] sm:$0xff] }
  0xd8   :  { %v4312_v24 = vpack.c.bf16 %v1853_v43, %v1850_v4  ;;  %v873_v43 = vld [vmem:[%s4637_s1 + $0xe8] sm:$0xff] }
  0xd9   :  { %2541 = vmatpush1.bf16.msra.mxu0 %v4272_v30 }
  0xda   :  { %2733 = vmatpush1.bf16.msra.mxu1 %v3939_v48  ;;  %2543 = vmatprep.subr.bf16.mxu0 %v4276_v31  ;;  %v897_v48 = vld [vmem:[%s4637_s1 + $0x1a8] sm:$0xff] }
  0xdb   :  { %2735 = vmatprep.subr.bf16.mxu1 %v3943_v36  ;;  %v2742_v45 = vpack.c.bf16 %v897_v48, %v894_v12  ;;  %v846_v36 = vld [vmem:[%s4637_s1 + $0x10] sm:$0xff]  ;;  %v924_v12 = vld [vmem:[%s4637_s1 + $0x280] sm:$0xff] }
  0xdc   :  { %v2744_v13 = vpack.c.bf16 %v849_v29, %v846_v36  ;;  %v876_v36 = vld [vmem:[%s4637_s1 + $0x100] sm:$0xff]  ;;  %v930_v29 = vld [vmem:[%s4637_s1 + $0x2b0] sm:$0xff] }
  0xdd   :  { %2545 = vmatpush1.bf16.msra.mxu0 %v4292_v35 }
  0xde   :  { %2737 = vmatpush1.bf16.msra.mxu1 %v3959_v18  ;;  %2547 = vmatprep.subr.bf16.mxu0 %v4296_v61  ;;  %v903_v18 = vld [vmem:[%s4637_s1 + $0x1d8] sm:$0xff] }
  0xdf   :  { %2739 = vmatprep.subr.bf16.mxu1 %v3963_v20  ;;  %v852_v20 = vld [vmem:[%s4637_s1 + $0x40] sm:$0xff]  ;;  %v2746_v42 = vpack.c.bf16 %v903_v18, %v900_v46 }
  0xe0   :  { %v2748_v23 = vpack.c.bf16 %v855_v1, %v852_v20  ;;  %v936_v20 = vld [vmem:[%s4637_s1 + $0x2e0] sm:$0xff] }
  0xe1   :  { %2549 = vmatpush1.bf16.msra.mxu0 %v4312_v24 }
  0xe2   :  { %2741 = vmatpush1.bf16.msra.mxu1 %v3979_v41  ;;  %2743 = vmatprep.subr.bf16.mxu0 %v2742_v45  ;;  %v906_v41 = vld [vmem:[%s4637_s1 + $0x1f0] sm:$0xff] }
  0xe3   :  { %2775 = vmatprep.subr.bf16.mxu1 %v3983_v62  ;;  %v2750_v62 = vpack.c.bf16 %v909_v22, %v906_v41  ;;  %v891_v22 = vld [vmem:[%s4637_s1 + $0x178] sm:$0xff] }
  0xe4   :  { %715 = vmatmul.mubr.f32.vlgmr.msra.gmra.mrb[0].mxu0 %v3481_v2  ;;  %v861_v2 = vld [vmem:[%s4637_s1 + $0x88] sm:$0xff] }
  0xe5   :  { %1271 = vmatmul.mubr.f32.vlgmr.msra.gmra.mrb[8].mxu1 %v4333_v33  ;;  %2745 = vmatpush3.bf16.msra.mxu0 %v2744_v13  ;;  %v2752_v40 = vpack.c.bf16 %v861_v2, %v858_v16  ;;  %v882_v13 = vld [vmem:[%s4637_s1 + $0x130] sm:$0xff]  ;;  %v2020_v2 = vld [vmem:[%s4637_s1 + $0x7c0] sm:$0xff] }
  0xe6   :  { %2777 = vmatpush1.bf16.msra.mxu1 %v3999_v11  ;;  %720 = vmatprep.mubr.f32.mxu0 %v3345_v17  ;;  %v915_v17 = vld [vmem:[%s4637_s1 + $0x238] sm:$0xff]  ;;  %v1966_v16 = vld [vmem:[%s4637_s1 + $0x610] sm:$0xff] }
  0xe7   :  { %2747 = vmatprep.subr.bf16.mxu0 %v2746_v42  ;;  %2779 = vmatprep.subr.bf16.mxu1 %v4003_v49  ;;  %v4377_v11 = vld [vmem:[%s4638_s0 + $0x38] sm:$0x3]  ;;  %v4384_v49 = vsel %vm639_vm1, %v1465_v63, %v4357_v5  ;;  %v2754_v9 = vpack.c.bf16 %v915_v17, %v912_v51 }
  0xe8   :  { %721 = vmatmul.mubr.f32.gmra.mrb[2].mxu0 %v3463_v54  ;;  %1276 = vmatprep.mubr.f32.mxu1 %v4377_v11  ;;  %v867_v54 = vld [vmem:[%s4637_s1 + $0xb8] sm:$0xff] }
  0xe9   :  { %2749 = vmatpush3.bf16.msra.mxu0 %v2748_v23  ;;  %1347 = vmatprep.mubr.f32.mxu0 %v4050_v25  ;;  %v4396_v25 = vld [vmem:[%s4638_s0 + $0x30] sm:$0x3]  ;;  %v2756_v21 = vpack.c.bf16 %v867_v54, %v864_v57  ;;  %v1975_v57 = vld [vmem:[%s4637_s1 + $0x658] sm:$0xff] }
  0xea   :  { %2781 = vmatpush1.bf16.msra.mxu1 %v4021_v27  ;;  %2751 = vmatprep.subr.bf16.mxu0 %v2750_v62  ;;  %v918_v27 = vld [vmem:[%s4637_s1 + $0x250] sm:$0xff] }
  0xeb   :  { %2783 = vmatprep.subr.bf16.mxu1 %v4025_v7  ;;  %1277 = vmatmul.mubr.f32.gmra.mrb[10].mxu1 %v4396_v25  ;;  %v2758_v4 = vpack.c.bf16 %v921_v34, %v918_v27  ;;  %v870_v7 = vld [vmem:[%s4637_s1 + $0xd0] sm:$0xff] }
  0xec   :  { %1536 = vmatprep.mubr.f32.mxu1 %v4384_v49  ;;  %v2760_v48 = vpack.c.bf16 %v873_v43, %v870_v7  ;;  %v2014_v23 = vld [vmem:[%s4637_s1 + $0x790] sm:$0xff]  ;;  %v1987_v43 = vld [vmem:[%s4637_s1 + $0x6b8] sm:$0xff] }
  0xed   :  { %2753 = vmatpush3.bf16.msra.mxu0 %v2752_v40  ;;  %v2026_v27 = vld [vmem:[%s4637_s1 + $0x7f0] sm:$0xff] }
  0xee   :  { %2785 = vmatpush1.bf16.msra.mxu1 %v4044_v60  ;;  %2755 = vmatprep.subr.bf16.mxu0 %v2754_v9  ;;  %v927_v60 = vld [vmem:[%s4637_s1 + $0x298] sm:$0xff] }
  0xef   :  { %2787 = vmatprep.subr.bf16.mxu1 %v4054_v37  ;;  %v2762_v45 = vpack.c.bf16 %v927_v60, %v924_v12  ;;  %v879_v37 = vld [vmem:[%s4637_s1 + $0x118] sm:$0xff]  ;;  %v1990_v60 = vld [vmem:[%s4637_s1 + $0x6d0] sm:$0xff] }
  0xf0   :  { %v2764_v46 = vpack.c.bf16 %v879_v37, %v876_v36  ;;  %v1996_v37 = vld [vmem:[%s4637_s1 + $0x700] sm:$0xff] }
  0xf1   :  { %2757 = vmatpush3.bf16.msra.mxu0 %v2756_v21 }
  0xf2   :  { %2789 = vmatpush1.bf16.msra.mxu1 %v4072_v26  ;;  %2759 = vmatprep.subr.bf16.mxu0 %v2758_v4  ;;  %v933_v26 = vld [vmem:[%s4637_s1 + $0x2c8] sm:$0xff] }
  0xf3   :  { %2791 = vmatprep.subr.bf16.mxu1 %v4076_v44  ;;  %v2766_v18 = vpack.c.bf16 %v933_v26, %v930_v29  ;;  %v885_v44 = vld [vmem:[%s4637_s1 + $0x148] sm:$0xff]  ;;  %v2050_v29 = vld [vmem:[%s4637_s1 + $0x8b0] sm:$0xff] }
  0xf4   :  { %v2768_v50 = vpack.c.bf16 %v885_v44, %v882_v13  ;;  %v1981_v4 = vld [vmem:[%s4637_s1 + $0x688] sm:$0xff]  ;;  %v2056_v13 = vld [vmem:[%s4637_s1 + $0x8e0] sm:$0xff] }
  0xf5   :  { %2761 = vmatpush3.bf16.msra.mxu0 %v2760_v48  ;;  %v2044_v48 = vld [vmem:[%s4637_s1 + $0x880] sm:$0xff] }
  0xf6   :  { %2793 = vmatpush1.bf16.msra.mxu1 %v4092_v19  ;;  %2763 = vmatprep.subr.bf16.mxu0 %v2762_v45  ;;  %v939_v19 = vld [vmem:[%s4637_s1 + $0x2f8] sm:$0xff] }
  0xf7   :  { %2795 = vmatprep.subr.bf16.mxu1 %v4096_v3  ;;  %v2770_v41 = vpack.c.bf16 %v939_v19, %v936_v20  ;;  %v888_v3 = vld [vmem:[%s4637_s1 + $0x160] sm:$0xff] }
  0xf8   :  { %v2136_v1 = vpop.f32.mrb[0].mxu1  ;;  %v2772_v63 = vpack.c.bf16 %v891_v22, %v888_v3  ;;  %v1962_v3 = vld [vmem:[%s4638_s0 + $0x30] sm:$0xf] }
  0xf9   :  { %2765 = vmatpush3.bf16.msra.mxu0 %v2764_v46  ;;  %v2137_v56 = vpop.f32.mrb[1].mxu1 }
  0xfa   :  { %2797 = vmatpush1.bf16.msra.mxu1 %v4112_v32  ;;  %v4450_v42 = vadd.f32 %v2137_v56, %v2136_v1  ;;  %2767 = vmatprep.subr.bf16.mxu0 %v2766_v18  ;;  %v2017_v32 = vld [vmem:[%s4637_s1 + $0x7a8] sm:$0xff]  ;;  %v2002_v18 = vld [vmem:[%s4637_s1 + $0x730] sm:$0xff]  ;;  %v2008_v1 = vld [vmem:[%s4637_s1 + $0x760] sm:$0xff] }
  0xfb   :  { %2799 = vmatprep.subr.bf16.mxu1 %v4116_v8  ;;  %v2838_v62 = vpack.c.bf16 %v2017_v32, %v2014_v23  ;;  %v1969_v8 = vld [vmem:[%s4637_s1 + $0x628] sm:$0xff]  ;;  %v1463_v23 = vrot.slane %v1962_v3, 2 }
  0xfc   :  { %v2139_v51 = vpop.f32.mrb[2].mxu1  ;;  %v2840_v17 = vpack.c.bf16 %v1969_v8, %v1966_v16 }
  0xfd   :  { %2769 = vmatpush3.bf16.msra.mxu0 %v2768_v50  ;;  %v2140_v40 = vpop.f32.mrb[3].mxu1  ;;  %v2011_v50 = vld [vmem:[%s4637_s1 + $0x778] sm:$0xff] }
  0xfe   :  { %2801 = vmatpush1.bf16.msra.mxu1 %v4132_v53  ;;  %2771 = vmatprep.subr.bf16.mxu0 %v2770_v41  ;;  %v2023_v53 = vld [vmem:[%s4637_s1 + $0x7d8] sm:$0xff]  ;;  %v4486_v54 = vadd.f32 %v2140_v40, %v2139_v51  ;;  %v1960_v41 = vld [vmem:[%s4638_s0 + $0x20] sm:$0xfc]  ;;  %v2868_v22 = vpack.c.bf16 %v2011_v50, %v2008_v1 }
  0xff   :  { %2803 = vmatprep.subr.bf16.mxu1 %v4136_v58  ;;  %v2842_v9 = vpack.c.bf16 %v2023_v53, %v2020_v2  ;;  %v1972_v58 = vld [vmem:[%s4637_s1 + $0x640] sm:$0xff] }
 0x100   :  { %v2844_v34 = vpack.c.bf16 %v1975_v57, %v1972_v58  ;;  %v808_v53 = vld [vmem:[%s4639_s2] sm:$0x7] }
 0x101   :  { %2773 = vmatpush3.bf16.msra.mxu0 %v2772_v63 }
 0x102   :  { %2805 = vmatpush1.bf16.msra.mxu1 %v4152_v6  ;;  %2839 = vmatprep.subr.bf16.mxu0 %v2838_v62  ;;  %v2029_v6 = vld [vmem:[%s4637_s1 + $0x808] sm:$0xff] }
 0x103   :  { %2807 = vmatprep.subr.bf16.mxu1 %v4156_v28  ;;  %v2846_v21 = vpack.c.bf16 %v2029_v6, %v2026_v27  ;;  %v1978_v28 = vld [vmem:[%s4637_s1 + $0x670] sm:$0xff] }
 0x104   :  { %1348 = vmatmul.mubr.f32.vlgmr.msra.gmra.mrb[8].mxu0 %v4333_v33  ;;  %v2032_v33 = vld [vmem:[%s4637_s1 + $0x820] sm:$0xff] }
 0x105   :  { %2841 = vmatpush3.bf16.msra.mxu0 %v2840_v17  ;;  %1352 = vmatprep.mubr.f32.mxu0 %v4377_v11  ;;  %v2848_v11 = vpack.c.bf16 %v1981_v4, %v1978_v28 }
 0x106   :  { %2809 = vmatpush1.bf16.msra.mxu1 %v4172_v39  ;;  %2843 = vmatprep.subr.bf16.mxu0 %v2842_v9  ;;  %v2035_v39 = vld [vmem:[%s4637_s1 + $0x838] sm:$0xff] }
 0x107   :  { %2811 = vmatprep.subr.bf16.mxu1 %v4176_v47  ;;  %v2850_v7 = vpack.c.bf16 %v2035_v39, %v2032_v33  ;;  %v1984_v47 = vld [vmem:[%s4637_s1 + $0x6a0] sm:$0xff] }
 0x108   :  { %1353 = vmatmul.mubr.f32.gmra.mrb[10].mxu0 %v4396_v25  ;;  %v2038_v25 = vld [vmem:[%s4637_s1 + $0x850] sm:$0xff] }
 0x109   :  { %2845 = vmatpush3.bf16.msra.mxu0 %v2844_v34  ;;  %1613 = vmatprep.mubr.f32.mxu0 %v4384_v49  ;;  %v2852_v49 = vpack.c.bf16 %v1987_v43, %v1984_v47 }
 0x10a   :  { %2813 = vmatpush1.bf16.msra.mxu1 %v4192_v52  ;;  %2847 = vmatprep.subr.bf16.mxu0 %v2846_v21  ;;  %v2041_v52 = vld [vmem:[%s4637_s1 + $0x868] sm:$0xff] }
 0x10b   :  { %2815 = vmatprep.subr.bf16.mxu1 %v4196_v55  ;;  %v2854_v12 = vpack.c.bf16 %v2041_v52, %v2038_v25  ;;  %v1993_v55 = vld [vmem:[%s4637_s1 + $0x6e8] sm:$0xff] }
 0x10c   :  { %v2856_v45 = vpack.c.bf16 %v1993_v55, %v1990_v60 }
 0x10d   :  { %2849 = vmatpush3.bf16.msra.mxu0 %v2848_v11 }
 0x10e   :  { %2817 = vmatpush1.bf16.msra.mxu1 %v4212_v38  ;;  %2851 = vmatprep.subr.bf16.mxu0 %v2850_v7  ;;  %v2047_v38 = vld [vmem:[%s4637_s1 + $0x898] sm:$0xff] }
 0x10f   :  { %2819 = vmatprep.subr.bf16.mxu1 %v4216_v59  ;;  %v2858_v36 = vpack.c.bf16 %v2047_v38, %v2044_v48  ;;  %v1999_v59 = vld [vmem:[%s4637_s1 + $0x718] sm:$0xff] }
 0x110   :  { %v2860_v26 = vpack.c.bf16 %v1999_v59, %v1996_v37 }
 0x111   :  { %2853 = vmatpush3.bf16.msra.mxu0 %v2852_v49 }
 0x112   :  { %2821 = vmatpush1.bf16.msra.mxu1 %v4232_v0  ;;  %2855 = vmatprep.subr.bf16.mxu0 %v2854_v12  ;;  %v2053_v0 = vld [vmem:[%s4637_s1 + $0x8c8] sm:$0xff] }
 0x113   :  { %2823 = vmatprep.subr.bf16.mxu1 %v4236_v14  ;;  %v2862_v46 = vpack.c.bf16 %v2053_v0, %v2050_v29  ;;  %v2005_v14 = vld [vmem:[%s4637_s1 + $0x748] sm:$0xff] }
 0x114   :  { %v2864_v19 = vpack.c.bf16 %v2005_v14, %v2002_v18 }
 0x115   :  { %2857 = vmatpush3.bf16.msra.mxu0 %v2856_v45 }
 0x116   :  { %2825 = vmatpush1.bf16.msra.mxu1 %v4252_v15  ;;  %2859 = vmatprep.subr.bf16.mxu0 %v2858_v36  ;;  %v2059_v15 = vld [vmem:[%s4637_s1 + $0x8f8] sm:$0xff] }
 0x117   :  { %2827 = vmatprep.subr.bf16.mxu1 %v4256_v10  ;;  %v2866_v10 = vpack.c.bf16 %v2059_v15, %v2056_v13 }
 0x118   :  { %v2174_v44 = vpop.f32.mrb[4].mxu1 }
 0x119   :  { %2861 = vmatpush3.bf16.msra.mxu0 %v2860_v26  ;;  %v2175_v20 = vpop.f32.mrb[5].mxu1 }
 0x11a   :  { %2829 = vmatpush1.bf16.msra.mxu1 %v4272_v30  ;;  %v2176_v56 = vadd.f32 %v2175_v20, %v2174_v44  ;;  %2863 = vmatprep.subr.bf16.mxu0 %v2862_v46  ;;  %v1462_v30 = vrot.slane %v1960_v41, 2  ;;  %v1630_v46 = vld [vmem:[%s4639_s2] sm:$0x7] }
 0x11b   :  { %2831 = vmatprep.subr.bf16.mxu1 %v4276_v31  ;;  %v810_v31 = vlaneseq }
 0x11c   :  { %v1464_v16 = vsel %vm639_vm1, %v1462_v30, %v1463_v23 }
 0x11d   :  { %2865 = vmatpush3.bf16.msra.mxu0 %v2864_v19 }
 0x11e   :  { %2833 = vmatpush1.bf16.msra.mxu1 %v4292_v35  ;;  %2867 = vmatprep.subr.bf16.mxu0 %v2866_v10  ;;  %v2177_v32 = vpop.f32.mrb[6].mxu1  ;;  %v811_v35 = vshrl.u32 %v810_v31, 7 }
 0x11f   :  { %2835 = vmatprep.subr.bf16.mxu1 %v4296_v61  ;;  %v2178_v63 = vpop.f32.mrb[7].mxu1 }
 0x120   :  { %v2179_v62 = vadd.f32 %v2178_v63, %v2177_v32  ;;  %v820_v2 = vsub.s32 2, %v811_v35  ;;  %v812_v39 = vsub.s32 0, %v811_v35  ;;  %v816_v11 = vsub.s32 1, %v811_v35 }
 0x121   :  { %2869 = vmatpush3.bf16.msra.mxu0 %v2868_v22 }
 0x122   :  { %2837 = vmatpush1.bf16.msra.mxu1 %v4312_v24  ;;  %v821_v40 = vrot.slane %v808_v53, %v820_v2  ;;  %v813_v7 = vrot.slane %v808_v53, %v812_v39  ;;  %v817_v47 = vrot.slane %v808_v53, %v816_v11  ;;  %v1635_v18 = vrot.slane %v1630_v46, %v812_v39 }
 0x123   :  { %v1639_v14 = vrot.slane %v1630_v46, %v816_v11 }
 0x124   :  { %1614 = vmatmul.mubr.f32.vlgmr.msra.gmra.mrb[12].mxu0 %v1464_v16 }
 0x125   :  { %1537 = vmatmul.mubr.f32.vlgmr.msra.gmra.mrb[8].mxu1 %v1464_v16  ;;  %1618 = vmatprep.mubr.f32.mxu0 %v4357_v5 }
 0x126   :  { %1542 = vmatprep.mubr.f32.mxu1 %v4357_v5 }
 0x128   :  { %1619 = vmatmul.mubr.f32.gmra.mrb[14].mxu0 %v1463_v23 }
 0x129   :  { %1543 = vmatmul.mubr.f32.gmra.mrb[10].mxu1 %v1463_v23 }
 0x137   :  { %v2098_v8 = vpop.f32.mrb[4].mxu0 }
 0x138   :  { %v2099_v61 = vpop.f32.mrb[5].mxu0 }
 0x139   :  { %v2100_v51 = vadd.f32 %v2099_v61, %v2098_v8 }
 0x13b   :  { %v526_v24 = vadd.f32 %v4450_v42, %v2100_v51  ;;  %v2101_v17 = vpop.f32.mrb[6].mxu0 }
 0x13c   :  { %v2102_v9 = vpop.f32.mrb[7].mxu0 }
 0x13d   :  { %v804_v58 = vadd.f32 %v2176_v56, %v526_v24  ;;  %v2103_v57 = vadd.f32 %v2102_v9, %v2101_v17  ;;  %v1643_v56 = vrot.slane %v1630_v46, %v820_v2 }
 0x13f   :  { %v531_v5 = vadd.f32 %v4486_v54, %v2103_v57  ;;  %v827_v27 = vadd.f32 %v821_v40, %v804_v58 }
 0x141   :  { %v807_v6 = vadd.f32 %v2179_v62, %v531_v5  ;;  %834 = vst.msk [vmem:[%s4640_s3 + $0x10] sm:$0xff] %vm833_vm2, %v827_v27 }
 0x143   :  { %v830_v34 = vadd.f32 %v821_v40, %v807_v6 }
 0x145   :  { %838 = vst.msk [vmem:[%s4640_s3 + $0x28] sm:$0x3] %vm837_vm3, %v830_v34 }
 0x178   :  { %v2212_v42 = vpop.f32.mrb[12].mxu1 }
 0x179   :  { %v2213_v21 = vpop.f32.mrb[13].mxu1 }
 0x17a   :  { %v2214_v28 = vadd.f32 %v2213_v21, %v2212_v42 }
 0x17c   :  { %v2215_v4 = vpop.f32.mrb[14].mxu1 }
 0x17d   :  { %v2216_v33 = vpop.f32.mrb[15].mxu1 }
 0x17e   :  { %v2217_v54 = vadd.f32 %v2216_v33, %v2215_v4 }
 0x1b7   :  { %v716_v43 = vpop.f32.mrb[0].mxu0 }
 0x1b8   :  { %v825_v25 = vadd.f32 %v813_v7, %v716_v43  ;;  %v718_v52 = vpop.f32.mrb[1].mxu0 }
 0x1b9   :  { %v826_v49 = vadd.f32 %v817_v47, %v718_v52 }
 0x1ba   :  { %831 = vst [vmem:[%s4640_s3] sm:$0xff] %v825_v25 }
 0x1bb   :  { %832 = vst [vmem:[%s4640_s3 + $0x8] sm:$0xff] %v826_v49  ;;  %v722_v12 = vpop.f32.mrb[2].mxu0 }
 0x1bc   :  { %v828_v60 = vadd.f32 %v813_v7, %v722_v12  ;;  %v724_v55 = vpop.f32.mrb[3].mxu0 }
 0x1bd   :  { %v829_v48 = vadd.f32 %v817_v47, %v724_v55 }
 0x1be   :  { %835 = vst [vmem:[%s4640_s3 + $0x18] sm:$0x3] %v828_v60 }
 0x1bf   :  { %836 = vst [vmem:[%s4640_s3 + $0x20] sm:$0x3] %v829_v48 }
 0x1d7   :  { %v2250_v38 = vpop.f32.mrb[8].mxu0 }
 0x1d8   :  { %v2251_v45 = vpop.f32.mrb[9].mxu0 }
 0x1d9   :  { %v2252_v36 = vadd.f32 %v2251_v45, %v2250_v38 }
 0x1db   :  { %v1350_v37 = vadd.f32 %v2252_v36, %v2214_v28  ;;  %v2253_v59 = vpop.f32.mrb[10].mxu0 }
 0x1dc   :  { %v2254_v29 = vpop.f32.mrb[11].mxu0 }
 0x1dd   :  { %v2255_v0 = vadd.f32 %v2254_v29, %v2253_v59 }
 0x1df   :  { %v1355_v26 = vadd.f32 %v2255_v0, %v2217_v54 }
 0x1f7   :  { %v2288_v13 = vpop.f32.mrb[12].mxu0 }
 0x1f8   :  { %v1538_v15 = vpop.f32.mrb[8].mxu1  ;;  %v2289_v44 = vpop.f32.mrb[13].mxu0 }
 0x1f9   :  { %v1647_v20 = vadd.f32 %v1635_v18, %v1538_v15  ;;  %v1540_v19 = vpop.f32.mrb[9].mxu1  ;;  %v2290_v1 = vadd.f32 %v2289_v44, %v2288_v13 }
 0x1fa   :  { %v1648_v10 = vadd.f32 %v1639_v14, %v1540_v19 }
 0x1fb   :  { %2060 = vst [vmem:[%s4640_s3 + $0x30] sm:$0xff] %v1647_v20  ;;  %v1626_v50 = vadd.f32 %v2290_v1, %v1350_v37  ;;  %v2291_v41 = vpop.f32.mrb[14].mxu0 }
 0x1fc   :  { %2061 = vst [vmem:[%s4640_s3 + $0x38] sm:$0xff] %v1648_v10  ;;  %v1544_v3 = vpop.f32.mrb[10].mxu1  ;;  %v2292_v22 = vpop.f32.mrb[15].mxu0 }
 0x1fd   :  { %v1649_v30 = vadd.f32 %v1643_v56, %v1626_v50  ;;  %v1650_v23 = vadd.f32 %v1635_v18, %v1544_v3  ;;  %v1546_v32 = vpop.f32.mrb[11].mxu1  ;;  %v2293_v63 = vadd.f32 %v2292_v22, %v2291_v41 }
 0x1fe   :  { %v1651_v62 = vadd.f32 %v1639_v14, %v1546_v32 }
 0x1ff   :  { %2062 = vst.msk [vmem:[%s4640_s3 + $0x40] sm:$0xff] %vm833_vm2, %v1649_v30  ;;  %2063 = vst [vmem:[%s4640_s3 + $0x48] sm:$0x3] %v1650_v23  ;;  %v1629_v16 = vadd.f32 %v2293_v63, %v1355_v26 }
 0x200   :  { %2064 = vst [vmem:[%s4640_s3 + $0x50] sm:$0x3] %v1651_v62 }
 0x201   :  { %v1652_v31 = vadd.f32 %v1643_v56, %v1629_v16 }
 0x203   :  { %2065 = vst.msk [vmem:[%s4640_s3 + $0x58] sm:$0x3] %vm837_vm3, %v1652_v31 }

</bundles_post_ra>
